<compile_context>
chip_gen: v5e
topology: v5e:2x2
jax: 0.10.0
libtpu: 0.0.40
codegen_flags: <defaults>
</compile_context>

<pallas_src>
import math

import jax
import jax.numpy as jnp
from jax.experimental import pallas as pl
from jax.experimental.pallas import tpu as pltpu

# ----------------------------- model config ---------------------------------
B = 2                  # batch
T_IN = 35              # raw input frames
IDIM = 20              # raw feature dim
D = 32                 # attention_dim (model dim)
N_HEADS = 4            # attention heads
DK = D // N_HEADS
H_FF = 64              # positionwise feed-forward hidden units
L = 6                  # num_blocks (stacked encoder layers)
EPS = 1e-12            # torch.nn.LayerNorm(nout, eps=1e-12)

T = ((T_IN - 1) // 2 - 1) // 2       # time after Conv2dSubsampling  -> 8
F_SUB = ((IDIM - 1) // 2 - 1) // 2   # freq after Conv2dSubsampling  -> 4

NEG_MIN = float(jnp.finfo(jnp.float32).min)

# ------------------------- packed parameter layout ---------------------------
# Per-layer weight slab (W_ROWS, W_COLS) f32, every operand 128-lane aligned:
#   cols [  0, 128)  rows [0, D)    : Wq|Wk|Wv  (fused QKV, 3D = 96 cols used)
#   cols [128, 256)  rows [0, D)    : Wo        (D  = 32 cols used)
#   cols [256, 384)  rows [0, D)    : W1        (H_FF = 64 cols used)
#   cols [384, 512)  rows [0, H_FF) : W2        (D  = 32 cols used)
QKV_C0, WO_C0, W1_C0, W2_C0 = 0, 128, 256, 384
W_ROWS, W_COLS = max(D, H_FF), 512

# Per-layer bias / LayerNorm slab: 8 rows x 128 lanes = one (8,128) VMEM tile.
R_G1, R_BE1, R_G2, R_BE2, R_BQKV, R_BO, R_BF1, R_BF2 = range(8)
B_ROWS, B_COLS = 8, 128


def _layer_norm(x, gamma, beta):
    # x: (N, D); gamma/beta: (1, D). Biased variance, as in torch LayerNorm.
    mean = jnp.mean(x, axis=-1, keepdims=True)
    var = jnp.mean((x - mean) ** 2, axis=-1, keepdims=True)
    return (x - mean) * jax.lax.rsqrt(var + EPS) * gamma + beta


# ------------------------------ Pallas kernel --------------------------------
def encoder_stack_kernel(x_ref, mask_ref, w_ref, b_ref, an_ref, o_ref):
    """One grid step == one EncoderLayer; o_ref is the resident activation carry."""
    layer = pl.program_id(0)
    n_layers = pl.num_programs(0)

    @pl.when(layer == 0)
    def _():
        o_ref[...] = x_ref[...]            # seed the VMEM-resident carry

    x = o_ref[...]                         # (B*T, D)
    keep = mask_ref[...] > 0.0             # (B, 1, T) key mask

    bias = b_ref[...]                      # (8, 128) slab for this layer
    g1 = bias[R_G1:R_G1 + 1, 0:D]
    be1 = bias[R_BE1:R_BE1 + 1, 0:D]
    g2 = bias[R_G2:R_G2 + 1, 0:D]
    be2 = bias[R_BE2:R_BE2 + 1, 0:D]
    bqkv = bias[R_BQKV:R_BQKV + 1, 0:3 * D]
    bo = bias[R_BO:R_BO + 1, 0:D]
    bf1 = bias[R_BF1:R_BF1 + 1, 0:H_FF]
    bf2 = bias[R_BF2:R_BF2 + 1, 0:D]

    # ---- self-attention block (pre-norm) ----
    residual = x
    xn = _layer_norm(x, g1, be1)
    qkv = jnp.dot(xn, w_ref[0:D, QKV_C0:QKV_C0 + 3 * D],
                  preferred_element_type=jnp.float32) + bqkv        # (B*T, 3D)

    scale = 1.0 / math.sqrt(DK)
    q3 = (qkv[:, 0:D] * scale).reshape(B, T, D)                     # scale folded into Q
    k3 = qkv[:, D:2 * D].reshape(B, T, D)
    v3 = qkv[:, 2 * D:3 * D].reshape(B, T, D)

    # Stack heads on the batch axis -> ONE batched contraction for all heads.
    def heads_to_batch(t):                 # (B, T, D) -> (H*B, T, DK), idx = h*B+b
        return jnp.concatenate(
            [t[:, :, h * DK:(h + 1) * DK] for h in range(N_HEADS)], axis=0)

    q_hb = heads_to_batch(q3)
    k_hb = heads_to_batch(k3)
    v_hb = heads_to_batch(v3)

    sc = jnp.einsum("bqd,bkd->bqk", q_hb, k_hb,
                    preferred_element_type=jnp.float32)             # (H*B, T, T)
    sc4 = sc.reshape(N_HEADS, B, T, T)                              # leading split only
    sc4 = jnp.where(keep[None], sc4, NEG_MIN)                       # masked_fill(min)
    m = jnp.max(sc4, axis=-1, keepdims=True)
    e = jnp.exp(sc4 - m)
    # denominator >= 1 always (exp(max-max)=1) -> exact, NaN-free, even for
    # fully-masked rows (those become 1/T here and are zeroed just below,
    # exactly like torch softmax(...).masked_fill(mask, 0.0)).
    p4 = e / jnp.sum(e, axis=-1, keepdims=True)
    p4 = jnp.where(keep[None], p4, 0.0)
    p_hb = p4.reshape(N_HEADS * B, T, T)
    ctx = jnp.einsum("bqk,bkd->bqd", p_hb, v_hb,
                     preferred_element_type=jnp.float32)            # (H*B, T, DK)

    # Concat heads back along lanes (cheap in-vreg) -> single fused Wo matmul.
    ctx_cat = jnp.concatenate(
        [ctx[h * B:(h + 1) * B] for h in range(N_HEADS)], axis=-1)  # (B, T, D)
    att = jnp.dot(ctx_cat.reshape(B * T, D), w_ref[0:D, WO_C0:WO_C0 + D],
                  preferred_element_type=jnp.float32) + bo
    x = residual + att                                              # dropout == identity

    # ---- positionwise feed-forward block (pre-norm) ----
    residual = x
    xn = _layer_norm(x, g2, be2)
    h1 = jnp.maximum(
        jnp.dot(xn, w_ref[0:D, W1_C0:W1_C0 + H_FF],
                preferred_element_type=jnp.float32) + bf1, 0.0)
    ff = jnp.dot(h1, w_ref[0:H_FF, W2_C0:W2_C0 + D],
                 preferred_element_type=jnp.float32) + bf2
    y = residual + ff                                               # dropout == identity

    o_ref[...] = y                         # carry to next layer (stays in VMEM)

    @pl.when(layer == n_layers - 1)
    def _():                               # fused final after_norm on last layer only
        o_ref[...] = _layer_norm(y, an_ref[0:1, 0:D], an_ref[1:2, 0:D])


# ------------------------------ wrapper --------------------------------------
def pack_layer_params(layer_params):
    """Pack each layer's 16 tensors into one lane-aligned weight slab + one bias slab."""
    wslabs, bslabs = [], []
    for p in layer_params:
        w = jnp.zeros((W_ROWS, W_COLS), jnp.float32)
        w = w.at[0:D, QKV_C0:QKV_C0 + 3 * D].set(
            jnp.concatenate([p["wq"], p["wk"], p["wv"]], axis=1))
        w = w.at[0:D, WO_C0:WO_C0 + D].set(p["wo"])
        w = w.at[0:D, W1_C0:W1_C0 + H_FF].set(p["w1"])
        w = w.at[0:H_FF, W2_C0:W2_C0 + D].set(p["w2"])

        b = jnp.zeros((B_ROWS, B_COLS), jnp.float32)
        b = b.at[R_G1:R_G1 + 1, 0:D].set(p["g1"])
        b = b.at[R_BE1:R_BE1 + 1, 0:D].set(p["be1"])
        b = b.at[R_G2:R_G2 + 1, 0:D].set(p["g2"])
        b = b.at[R_BE2:R_BE2 + 1, 0:D].set(p["be2"])
        b = b.at[R_BQKV:R_BQKV + 1, 0:3 * D].set(
            jnp.concatenate([p["bq"], p["bk"], p["bv"]], axis=1))
        b = b.at[R_BO:R_BO + 1, 0:D].set(p["bo"])
        b = b.at[R_BF1:R_BF1 + 1, 0:H_FF].set(p["bf1"])
        b = b.at[R_BF2:R_BF2 + 1, 0:D].set(p["bf2"])
        wslabs.append(w)
        bslabs.append(b)
    return jnp.stack(wslabs), jnp.stack(bslabs)


@jax.jit
def encoder_layers(x, mask, wstack, bstack, an_slab):
    """Run all stacked EncoderLayers + after_norm in ONE pallas_call.

    x: (B, T, D) f32; mask: (B, 1, T) in {0,1}; wstack: (L, 64, 512);
    bstack: (L, 8, 128); an_slab: (8, 128).
    """
    Bx, Tx, Dx = x.shape
    n_layers = wstack.shape[0]
    x2 = x.reshape(Bx * Tx, Dx)                 # fold batch into matmul rows
    mask_f = mask.astype(jnp.float32)

    out = pl.pallas_call(
        encoder_stack_kernel,
        out_shape=jax.ShapeDtypeStruct((Bx * Tx, Dx), jnp.float32),
        grid_spec=pltpu.PrefetchScalarGridSpec(
            num_scalar_prefetch=0,
            grid=(n_layers,),                   # one grid step per encoder layer
            in_specs=[
                pl.BlockSpec((Bx * Tx, Dx), lambda l: (0, 0)),         # x (fetched once)
                pl.BlockSpec((Bx, 1, Tx), lambda l: (0, 0, 0)),        # mask
                pl.BlockSpec((None, W_ROWS, W_COLS), lambda l: (l, 0, 0)),  # per-layer W
                pl.BlockSpec((None, B_ROWS, B_COLS), lambda l: (l, 0, 0)),  # per-layer b/LN
                pl.BlockSpec((B_ROWS, B_COLS), lambda l: (0, 0)),      # after_norm slab
            ],
            out_specs=pl.BlockSpec((Bx * Tx, Dx), lambda l: (0, 0)),   # resident carry
        ),
        compiler_params=pltpu.CompilerParams(
            dimension_semantics=("arbitrary",),  # layers are sequential (carried state)
        ),
    )(x2, mask_f, wstack, bstack, an_slab)
    return out.reshape(Bx, Tx, Dx)


def conv2d_subsampling(x, mask, ep):
    """Conv2dSubsampling + PositionalEncoding (scale only) + mask subsampling.

    TODO(synk): this embed stage runs as plain XLA ops; it is not fused into
    the Pallas kernel.
    """
    h = x[:, None, :, :]                                            # NCHW
    h = jax.lax.conv_general_dilated(h, ep["c1w"], (2, 2), "VALID",
                                     dimension_numbers=("NCHW", "OIHW", "NCHW"))
    h = jnp.maximum(h + ep["c1b"][None, :, None, None], 0.0)
    h = jax.lax.conv_general_dilated(h, ep["c2w"], (2, 2), "VALID",
                                     dimension_numbers=("NCHW", "OIHW", "NCHW"))
    h = jnp.maximum(h + ep["c2b"][None, :, None, None], 0.0)
    b, c, t, f = h.shape
    h = jnp.transpose(h, (0, 2, 1, 3)).reshape(b, t, c * f)
    h = h @ ep["lw"] + ep["lb"]
    # PositionalEncoding.forward in this reference only scales (no pe added);
    # dropout is identity in eval mode.
    h = h * math.sqrt(D)
    return h, mask[:, :, :-2:2][:, :, :-2:2]


# --------------------------- pure-JAX reference -------------------------------
def encoder_layers_ref(x, mask, layer_params, an_g, an_b):
    def ln(t, g, b):
        mean = jnp.mean(t, axis=-1, keepdims=True)
        var = jnp.mean((t - mean) ** 2, axis=-1, keepdims=True)
        return (t - mean) * jax.lax.rsqrt(var + EPS) * g + b

    keep4 = (mask > 0.0)[:, :, None, :]                 # (B,1,1,T) over keys
    for p in layer_params:
        residual = x
        xn = ln(x, p["g1"], p["be1"])
        q = xn @ p["wq"] + p["bq"]
        k = xn @ p["wk"] + p["bk"]
        v = xn @ p["wv"] + p["bv"]

        def split(t):                                   # (B,T,D) -> (B,H,T,DK)
            return t.reshape(B, T, N_HEADS, DK).transpose(0, 2, 1, 3)

        sc = jnp.einsum("bhqd,bhkd->bhqk", split(q), split(k)) / math.sqrt(DK)
        sc = jnp.where(keep4, sc, NEG_MIN)
        pr = jax.nn.softmax(sc, axis=-1)
        pr = jnp.where(keep4, pr, 0.0)
        ctx = jnp.einsum("bhqk,bhkd->bhqd", pr, split(v))
        ctx = ctx.transpose(0, 2, 1, 3).reshape(B, T, D)
        x = residual + (ctx @ p["wo"] + p["bo"])

        residual = x
        xn = ln(x, p["g2"], p["be2"])
        x = residual + (jnp.maximum(xn @ p["w1"] + p["bf1"], 0.0) @ p["w2"] + p["bf2"])
    return ln(x, an_g, an_b)


# ------------------------------- main -----------------------------------------
if __name__ == "__main__":
    key = jax.random.PRNGKey(0)

    def rnd(k, shape, s=0.1):
        return (s * jax.random.normal(k, shape)).astype(jnp.float32)

    key, *eks = jax.random.split(key, 8)
    embed_params = {
        "c1w": rnd(eks[0], (D, 1, 3, 3)),
        "c1b": rnd(eks[1], (D,)),
        "c2w": rnd(eks[2], (D, D, 3, 3), 0.05),
        "c2b": rnd(eks[3], (D,)),
        "lw": rnd(eks[4], (D * F_SUB, D), 0.05),
        "lb": rnd(eks[5], (1, D)),
    }

    layer_params = []
    for _ in range(L):
        key, *ks = jax.random.split(key, 17)
        layer_params.append({
            "g1": 1.0 + rnd(ks[0], (1, D)), "be1": rnd(ks[1], (1, D)),
            "g2": 1.0 + rnd(ks[2], (1, D)), "be2": rnd(ks[3], (1, D)),
            "wq": rnd(ks[4], (D, D)), "bq": rnd(ks[5], (1, D)),
            "wk": rnd(ks[6], (D, D)), "bk": rnd(ks[7], (1, D)),
            "wv": rnd(ks[8], (D, D)), "bv": rnd(ks[9], (1, D)),
            "wo": rnd(ks[10], (D, D)), "bo": rnd(ks[11], (1, D)),
            "w1": rnd(ks[12], (D, H_FF)), "bf1": rnd(ks[13], (1, H_FF)),
            "w2": rnd(ks[14], (H_FF, D)), "bf2": rnd(ks[15], (1, D)),
        })

    key, k_an1, k_an2, k_x = jax.random.split(key, 4)
    an_g = 1.0 + rnd(k_an1, (1, D))
    an_b = rnd(k_an2, (1, D))
    an_slab = jnp.zeros((B_ROWS, B_COLS), jnp.float32)
    an_slab = an_slab.at[0:1, 0:D].set(an_g).at[1:2, 0:D].set(an_b)

    wstack, bstack = pack_layer_params(layer_params)   # pack 16*L tensors -> 2 stacks

    xs = jax.random.normal(k_x, (B, T_IN, IDIM), jnp.float32)
    # pad out the tail of batch element 1 so two subsampled key frames are masked
    masks = jnp.ones((B, 1, T_IN), jnp.float32).at[1, 0, 23:].set(0.0)

    # ---- Encoder.forward: embed -> stacked layers (Pallas) -> after_norm ----
    x_emb, mask_sub = conv2d_subsampling(xs, masks, embed_params)
    assert x_emb.shape == (B, T, D) and mask_sub.shape == (B, 1, T)

    out = encoder_layers(x_emb, mask_sub, wstack, bstack, an_slab)
    out = jax.block_until_ready(out)

    ref = encoder_layers_ref(x_emb, mask_sub, layer_params, an_g, an_b)
    assert out.shape == (B, T, D)
    err = jnp.max(jnp.abs(out - ref))
    assert jnp.allclose(out, ref, rtol=1e-4, atol=1e-4), f"max abs err = {err}"
    print("KERNEL_OK")
</pallas_src>

<mosaic_0001>
module attributes {stable_mosaic.version = 11 : i64} {
  func.func @encoder_stack_kernel(%arg0: i32, %arg1: memref<16x32xf32, #tpu.memory_space<vmem>>, %arg2: memref<2x1x8xf32, #tpu.memory_space<vmem>>, %arg3: memref<1x64x512xf32, #tpu.memory_space<vmem>>, %arg4: memref<1x8x128xf32, #tpu.memory_space<vmem>>, %arg5: memref<8x128xf32, #tpu.memory_space<vmem>>, %arg6: memref<16x32xf32, #tpu.memory_space<vmem>>) attributes {dimension_semantics = [#tpu.dimension_semantics<arbitrary>], iteration_bounds = array<i64: 6>, scalar_prefetch = 0 : i64, scratch_operands = 0 : i64, tpu.core_type = #tpu.core_type<tc>, window_params = [{pipeline_mode = #tpu.pipeline_mode<synchronous>, transform_indices = @transform_0, window_bounds = array<i64: 16, 32>}, {pipeline_mode = #tpu.pipeline_mode<synchronous>, transform_indices = @transform_1, window_bounds = array<i64: 2, 1, 8>}, {transform_indices = @transform_2, window_bounds = array<i64: 1, 64, 512>}, {transform_indices = @transform_3, window_bounds = array<i64: 1, 8, 128>}, {pipeline_mode = #tpu.pipeline_mode<synchronous>, transform_indices = @transform_4, window_bounds = array<i64: 8, 128>}, {pipeline_mode = #tpu.pipeline_mode<synchronous>, transform_indices = @transform_5, window_bounds = array<i64: 16, 32>}]} {
    %c0_i32 = arith.constant 0 : i32
    %0 = arith.cmpi eq, %arg0, %c0_i32 : i32
    %1 = arith.extui %0 : i1 to i32
    %c0_i32_0 = arith.constant 0 : i32
    %2 = arith.cmpi ne, %1, %c0_i32_0 : i32
    scf.if %2 {
      %c0_42 = arith.constant 0 : index
      %c0_43 = arith.constant 0 : index
      %141 = vector.load %arg1[%c0_42, %c0_43] : memref<16x32xf32, #tpu.memory_space<vmem>>, vector<16x32xf32>
      %c0_44 = arith.constant 0 : index
      %c0_45 = arith.constant 0 : index
      %142 = vector.load %arg6[%c0_44, %c0_45] : memref<16x32xf32, #tpu.memory_space<vmem>>, vector<16x32xf32>
      tpu.vector_store %arg6[%c0_44, %c0_45], %141 {strides = array<i32>} : memref<16x32xf32, #tpu.memory_space<vmem>>, vector<16x32xf32>,
    } else {
    }
    %c0 = arith.constant 0 : index
    %c0_1 = arith.constant 0 : index
    %3 = vector.load %arg6[%c0, %c0_1] : memref<16x32xf32, #tpu.memory_space<vmem>>, vector<16x32xf32>
    %c0_2 = arith.constant 0 : index
    %c0_3 = arith.constant 0 : index
    %c0_4 = arith.constant 0 : index
    %4 = vector.load %arg2[%c0_2, %c0_3, %c0_4] : memref<2x1x8xf32, #tpu.memory_space<vmem>>, vector<2x1x8xf32>
    %cst = arith.constant 0.000000e+00 : f32
    %5 = vector.broadcast %cst : f32 to vector<2x1x8xf32>
    %6 = arith.cmpf ogt, %4, %5 : vector<2x1x8xf32>
    %c0_5 = arith.constant 0 : index
    %c0_6 = arith.constant 0 : index
    %c0_7 = arith.constant 0 : index
    %7 = vector.load %arg4[%c0_5, %c0_6, %c0_7] : memref<1x8x128xf32, #tpu.memory_space<vmem>>, vector<1x8x128xf32>
    %8 = vector.shape_cast %7 : vector<1x8x128xf32> to vector<8x128xf32>
    %9 = vector.extract_strided_slice %8 {offsets = [0, 0], sizes = [1, 32], strides = [1, 1]} : vector<8x128xf32> to vector<1x32xf32>
    %10 = vector.extract_strided_slice %8 {offsets = [1, 0], sizes = [1, 32], strides = [1, 1]} : vector<8x128xf32> to vector<1x32xf32>
    %11 = vector.extract_strided_slice %8 {offsets = [2, 0], sizes = [1, 32], strides = [1, 1]} : vector<8x128xf32> to vector<1x32xf32>
    %12 = vector.extract_strided_slice %8 {offsets = [3, 0], sizes = [1, 32], strides = [1, 1]} : vector<8x128xf32> to vector<1x32xf32>
    %13 = vector.extract_strided_slice %8 {offsets = [4, 0], sizes = [1, 96], strides = [1, 1]} : vector<8x128xf32> to vector<1x96xf32>
    %14 = vector.extract_strided_slice %8 {offsets = [5, 0], sizes = [1, 32], strides = [1, 1]} : vector<8x128xf32> to vector<1x32xf32>
    %15 = vector.extract_strided_slice %8 {offsets = [6, 0], sizes = [1, 64], strides = [1, 1]} : vector<8x128xf32> to vector<1x64xf32>
    %16 = vector.extract_strided_slice %8 {offsets = [7, 0], sizes = [1, 32], strides = [1, 1]} : vector<8x128xf32> to vector<1x32xf32>
    %cst_8 = arith.constant dense<0.000000e+00> : vector<16xf32>
    %17 = vector.multi_reduction <add>, %3, %cst_8 [1] : vector<16x32xf32> to vector<16xf32>
    %18 = vector.shape_cast %17 : vector<16xf32> to vector<16x1xf32>
    %cst_9 = arith.constant 3.200000e+01 : f32
    %19 = vector.broadcast %cst_9 : f32 to vector<16x1xf32>
    %20 = arith.divf %18, %19 : vector<16x1xf32>
    %21 = vector.broadcast %20 : vector<16x1xf32> to vector<16x32xf32>
    %22 = arith.subf %3, %21 : vector<16x32xf32>
    %23 = arith.mulf %22, %22 : vector<16x32xf32>
    %cst_10 = arith.constant dense<0.000000e+00> : vector<16xf32>
    %24 = vector.multi_reduction <add>, %23, %cst_10 [1] : vector<16x32xf32> to vector<16xf32>
    %25 = vector.shape_cast %24 : vector<16xf32> to vector<16x1xf32>
    %cst_11 = arith.constant 3.200000e+01 : f32
    %26 = vector.broadcast %cst_11 : f32 to vector<16x1xf32>
    %27 = arith.divf %25, %26 : vector<16x1xf32>
    %28 = vector.broadcast %20 : vector<16x1xf32> to vector<16x32xf32>
    %29 = arith.subf %3, %28 : vector<16x32xf32>
    %cst_12 = arith.constant 9.99999996E-13 : f32
    %30 = vector.broadcast %cst_12 : f32 to vector<16x1xf32>
    %31 = arith.addf %27, %30 : vector<16x1xf32>
    %32 = math.rsqrt %31 : vector<16x1xf32>
    %33 = vector.broadcast %32 : vector<16x1xf32> to vector<16x32xf32>
    %34 = arith.mulf %29, %33 : vector<16x32xf32>
    %35 = vector.broadcast %9 : vector<1x32xf32> to vector<16x32xf32>
    %36 = arith.mulf %34, %35 : vector<16x32xf32>
    %37 = vector.broadcast %10 : vector<1x32xf32> to vector<16x32xf32>
    %38 = arith.addf %36, %37 : vector<16x32xf32>
    %c0_13 = arith.constant 0 : index
    %c0_14 = arith.constant 0 : index
    %c0_15 = arith.constant 0 : index
    %39 = vector.load %arg3[%c0_13, %c0_14, %c0_15] : memref<1x64x512xf32, #tpu.memory_space<vmem>>, vector<1x32x96xf32>
    %40 = vector.shape_cast %39 : vector<1x32x96xf32> to vector<32x96xf32>
    %cst_16 = arith.constant dense<0.000000e+00> : vector<16x96xf32>
    %41 = tpu.matmul %38, %40, %cst_16 {dimension_numbers = #tpu.dot_dimension_numbers<[1], [0], [0], [1], [0, 0, 1, 1], [], []>} : vector<16x32xf32>, vector<32x96xf32>, vector<16x96xf32> -> vector<16x96xf32>
    %42 = vector.broadcast %13 : vector<1x96xf32> to vector<16x96xf32>
    %43 = arith.addf %41, %42 : vector<16x96xf32>
    %44 = vector.extract_strided_slice %43 {offsets = [0, 0], sizes = [16, 32], strides = [1, 1]} : vector<16x96xf32> to vector<16x32xf32>
    %cst_17 = arith.constant 0.353553385 : f32
    %45 = vector.broadcast %cst_17 : f32 to vector<16x32xf32>
    %46 = arith.mulf %44, %45 : vector<16x32xf32>
    %47 = vector.shape_cast %46 : vector<16x32xf32> to vector<2x8x32xf32>
    %48 = vector.extract_strided_slice %43 {offsets = [0, 32], sizes = [16, 32], strides = [1, 1]} : vector<16x96xf32> to vector<16x32xf32>
    %49 = vector.shape_cast %48 : vector<16x32xf32> to vector<2x8x32xf32>
    %50 = vector.extract_strided_slice %43 {offsets = [0, 64], sizes = [16, 32], strides = [1, 1]} : vector<16x96xf32> to vector<16x32xf32>
    %51 = vector.shape_cast %50 : vector<16x32xf32> to vector<2x8x32xf32>
    %52 = vector.extract_strided_slice %47 {offsets = [0, 0, 0], sizes = [2, 8, 8], strides = [1, 1, 1]} : vector<2x8x32xf32> to vector<2x8x8xf32>
    %53 = vector.extract_strided_slice %47 {offsets = [0, 0, 8], sizes = [2, 8, 8], strides = [1, 1, 1]} : vector<2x8x32xf32> to vector<2x8x8xf32>
    %54 = vector.extract_strided_slice %47 {offsets = [0, 0, 16], sizes = [2, 8, 8], strides = [1, 1, 1]} : vector<2x8x32xf32> to vector<2x8x8xf32>
    %55 = vector.extract_strided_slice %47 {offsets = [0, 0, 24], sizes = [2, 8, 8], strides = [1, 1, 1]} : vector<2x8x32xf32> to vector<2x8x8xf32>
    %56 = tpu.concatenate %52, %53, %54, %55 in 0 : vector<2x8x8xf32>, vector<2x8x8xf32>, vector<2x8x8xf32>, vector<2x8x8xf32> -> vector<8x8x8xf32>
    %57 = vector.extract_strided_slice %49 {offsets = [0, 0, 0], sizes = [2, 8, 8], strides = [1, 1, 1]} : vector<2x8x32xf32> to vector<2x8x8xf32>
    %58 = vector.extract_strided_slice %49 {offsets = [0, 0, 8], sizes = [2, 8, 8], strides = [1, 1, 1]} : vector<2x8x32xf32> to vector<2x8x8xf32>
    %59 = vector.extract_strided_slice %49 {offsets = [0, 0, 16], sizes = [2, 8, 8], strides = [1, 1, 1]} : vector<2x8x32xf32> to vector<2x8x8xf32>
    %60 = vector.extract_strided_slice %49 {offsets = [0, 0, 24], sizes = [2, 8, 8], strides = [1, 1, 1]} : vector<2x8x32xf32> to vector<2x8x8xf32>
    %61 = tpu.concatenate %57, %58, %59, %60 in 0 : vector<2x8x8xf32>, vector<2x8x8xf32>, vector<2x8x8xf32>, vector<2x8x8xf32> -> vector<8x8x8xf32>
    %62 = vector.extract_strided_slice %51 {offsets = [0, 0, 0], sizes = [2, 8, 8], strides = [1, 1, 1]} : vector<2x8x32xf32> to vector<2x8x8xf32>
    %63 = vector.extract_strided_slice %51 {offsets = [0, 0, 8], sizes = [2, 8, 8], strides = [1, 1, 1]} : vector<2x8x32xf32> to vector<2x8x8xf32>
    %64 = vector.extract_strided_slice %51 {offsets = [0, 0, 16], sizes = [2, 8, 8], strides = [1, 1, 1]} : vector<2x8x32xf32> to vector<2x8x8xf32>
    %65 = vector.extract_strided_slice %51 {offsets = [0, 0, 24], sizes = [2, 8, 8], strides = [1, 1, 1]} : vector<2x8x32xf32> to vector<2x8x8xf32>
    %66 = tpu.concatenate %62, %63, %64, %65 in 0 : vector<2x8x8xf32>, vector<2x8x8xf32>, vector<2x8x8xf32>, vector<2x8x8xf32> -> vector<8x8x8xf32>
    "tpu.trace_start"() <{level = 10 : i32, message = "bqd,bkd->bqk"}> : () -> ()
    %cst_18 = arith.constant dense<0.000000e+00> : vector<8x8x8xf32>
    %67 = tpu.matmul %56, %61, %cst_18 {dimension_numbers = #tpu.dot_dimension_numbers<[2], [2], [1], [1], [0, 0, 0, 1, 1, 1], [0], [0]>} : vector<8x8x8xf32>, vector<8x8x8xf32>, vector<8x8x8xf32> -> vector<8x8x8xf32>
    "tpu.trace_stop"() : () -> ()
    %68 = vector.shape_cast %67 : vector<8x8x8xf32> to vector<4x2x8x8xf32>
    %69 = vector.shape_cast %6 : vector<2x1x8xi1> to vector<1x2x1x8xi1>
    %cst_19 = arith.constant -3.40282347E+38 : f32
    %70 = vector.shape_cast %69 : vector<1x2x1x8xi1> to vector<1x2x1x8xi1>
    %71 = vector.broadcast %70 : vector<1x2x1x8xi1> to vector<4x2x8x8xi1>
    %72 = vector.broadcast %cst_19 : f32 to vector<4x2x8x8xf32>
    %73 = arith.select %71, %68, %72 : vector<4x2x8x8xi1>, vector<4x2x8x8xf32>
    %cst_20 = arith.constant dense<0xFF800000> : vector<4x2x8xf32>
    %74 = vector.multi_reduction <maximumf>, %73, %cst_20 [3] : vector<4x2x8x8xf32> to vector<4x2x8xf32>
    %75 = vector.shape_cast %74 : vector<4x2x8xf32> to vector<4x2x8x1xf32>
    %76 = vector.broadcast %75 : vector<4x2x8x1xf32> to vector<4x2x8x8xf32>
    %77 = arith.subf %73, %76 : vector<4x2x8x8xf32>
    %78 = math.exp %77 : vector<4x2x8x8xf32>
    %cst_21 = arith.constant dense<0.000000e+00> : vector<4x2x8xf32>
    %79 = vector.multi_reduction <add>, %78, %cst_21 [3] : vector<4x2x8x8xf32> to vector<4x2x8xf32>
    %80 = vector.shape_cast %79 : vector<4x2x8xf32> to vector<4x2x8x1xf32>
    %81 = vector.broadcast %80 : vector<4x2x8x1xf32> to vector<4x2x8x8xf32>
    %82 = arith.divf %78, %81 : vector<4x2x8x8xf32>
    %83 = vector.shape_cast %6 : vector<2x1x8xi1> to vector<1x2x1x8xi1>
    %cst_22 = arith.constant 0.000000e+00 : f32
    %84 = vector.shape_cast %83 : vector<1x2x1x8xi1> to vector<1x2x1x8xi1>
    %85 = vector.broadcast %84 : vector<1x2x1x8xi1> to vector<4x2x8x8xi1>
    %86 = vector.broadcast %cst_22 : f32 to vector<4x2x8x8xf32>
    %87 = arith.select %85, %82, %86 : vector<4x2x8x8xi1>, vector<4x2x8x8xf32>
    %88 = vector.shape_cast %87 : vector<4x2x8x8xf32> to vector<8x8x8xf32>
    "tpu.trace_start"() <{level = 10 : i32, message = "bqk,bkd->bqd"}> : () -> ()
    %cst_23 = arith.constant dense<0.000000e+00> : vector<8x8x8xf32>
    %89 = tpu.matmul %88, %66, %cst_23 {dimension_numbers = #tpu.dot_dimension_numbers<[2], [1], [1], [2], [0, 0, 0, 1, 1, 2], [0], [0]>} : vector<8x8x8xf32>, vector<8x8x8xf32>, vector<8x8x8xf32> -> vector<8x8x8xf32>
    "tpu.trace_stop"() : () -> ()
    %90 = vector.extract_strided_slice %89 {offsets = [0, 0, 0], sizes = [2, 8, 8], strides = [1, 1, 1]} : vector<8x8x8xf32> to vector<2x8x8xf32>
    %91 = vector.extract_strided_slice %89 {offsets = [2, 0, 0], sizes = [2, 8, 8], strides = [1, 1, 1]} : vector<8x8x8xf32> to vector<2x8x8xf32>
    %92 = vector.extract_strided_slice %89 {offsets = [4, 0, 0], sizes = [2, 8, 8], strides = [1, 1, 1]} : vector<8x8x8xf32> to vector<2x8x8xf32>
    %93 = vector.extract_strided_slice %89 {offsets = [6, 0, 0], sizes = [2, 8, 8], strides = [1, 1, 1]} : vector<8x8x8xf32> to vector<2x8x8xf32>
    %94 = tpu.concatenate %90, %91, %92, %93 in 2 : vector<2x8x8xf32>, vector<2x8x8xf32>, vector<2x8x8xf32>, vector<2x8x8xf32> -> vector<2x8x32xf32>
    %95 = vector.shape_cast %94 : vector<2x8x32xf32> to vector<16x32xf32>
    %c0_24 = arith.constant 0 : index
    %c0_25 = arith.constant 0 : index
    %c128 = arith.constant 128 : index
    %96 = vector.load %arg3[%c0_24, %c0_25, %c128] : memref<1x64x512xf32, #tpu.memory_space<vmem>>, vector<1x32x32xf32>
    %97 = vector.shape_cast %96 : vector<1x32x32xf32> to vector<32x32xf32>
    %cst_26 = arith.constant dense<0.000000e+00> : vector<16x32xf32>
    %98 = tpu.matmul %95, %97, %cst_26 {dimension_numbers = #tpu.dot_dimension_numbers<[1], [0], [0], [1], [0, 0, 1, 1], [], []>} : vector<16x32xf32>, vector<32x32xf32>, vector<16x32xf32> -> vector<16x32xf32>
    %99 = vector.broadcast %14 : vector<1x32xf32> to vector<16x32xf32>
    %100 = arith.addf %98, %99 : vector<16x32xf32>
    %101 = arith.addf %3, %100 : vector<16x32xf32>
    %cst_27 = arith.constant dense<0.000000e+00> : vector<16xf32>
    %102 = vector.multi_reduction <add>, %101, %cst_27 [1] : vector<16x32xf32> to vector<16xf32>
    %103 = vector.shape_cast %102 : vector<16xf32> to vector<16x1xf32>
    %cst_28 = arith.constant 3.200000e+01 : f32
    %104 = vector.broadcast %cst_28 : f32 to vector<16x1xf32>
    %105 = arith.divf %103, %104 : vector<16x1xf32>
    %106 = vector.broadcast %105 : vector<16x1xf32> to vector<16x32xf32>
    %107 = arith.subf %101, %106 : vector<16x32xf32>
    %108 = arith.mulf %107, %107 : vector<16x32xf32>
    %cst_29 = arith.constant dense<0.000000e+00> : vector<16xf32>
    %109 = vector.multi_reduction <add>, %108, %cst_29 [1] : vector<16x32xf32> to vector<16xf32>
    %110 = vector.shape_cast %109 : vector<16xf32> to vector<16x1xf32>
    %cst_30 = arith.constant 3.200000e+01 : f32
    %111 = vector.broadcast %cst_30 : f32 to vector<16x1xf32>
    %112 = arith.divf %110, %111 : vector<16x1xf32>
    %113 = vector.broadcast %105 : vector<16x1xf32> to vector<16x32xf32>
    %114 = arith.subf %101, %113 : vector<16x32xf32>
    %cst_31 = arith.constant 9.99999996E-13 : f32
    %115 = vector.broadcast %cst_31 : f32 to vector<16x1xf32>
    %116 = arith.addf %112, %115 : vector<16x1xf32>
    %117 = math.rsqrt %116 : vector<16x1xf32>
    %118 = vector.broadcast %117 : vector<16x1xf32> to vector<16x32xf32>
    %119 = arith.mulf %114, %118 : vector<16x32xf32>
    %120 = vector.broadcast %11 : vector<1x32xf32> to vector<16x32xf32>
    %121 = arith.mulf %119, %120 : vector<16x32xf32>
    %122 = vector.broadcast %12 : vector<1x32xf32> to vector<16x32xf32>
    %123 = arith.addf %121, %122 : vector<16x32xf32>
    %c0_32 = arith.constant 0 : index
    %c0_33 = arith.constant 0 : index
    %c256 = arith.constant 256 : index
    %124 = vector.load %arg3[%c0_32, %c0_33, %c256] : memref<1x64x512xf32, #tpu.memory_space<vmem>>, vector<1x32x64xf32>
    %125 = vector.shape_cast %124 : vector<1x32x64xf32> to vector<32x64xf32>
    %cst_34 = arith.constant dense<0.000000e+00> : vector<16x64xf32>
    %126 = tpu.matmul %123, %125, %cst_34 {dimension_numbers = #tpu.dot_dimension_numbers<[1], [0], [0], [1], [0, 0, 1, 1], [], []>} : vector<16x32xf32>, vector<32x64xf32>, vector<16x64xf32> -> vector<16x64xf32>
    %127 = vector.broadcast %15 : vector<1x64xf32> to vector<16x64xf32>
    %128 = arith.addf %126, %127 : vector<16x64xf32>
    %cst_35 = arith.constant 0.000000e+00 : f32
    %129 = vector.broadcast %cst_35 : f32 to vector<16x64xf32>
    %130 = arith.maximumf %128, %129 : vector<16x64xf32>
    %c0_36 = arith.constant 0 : index
    %c0_37 = arith.constant 0 : index
    %c384 = arith.constant 384 : index
    %131 = vector.load %arg3[%c0_36, %c0_37, %c384] : memref<1x64x512xf32, #tpu.memory_space<vmem>>, vector<1x64x32xf32>
    %132 = vector.shape_cast %131 : vector<1x64x32xf32> to vector<64x32xf32>
    %cst_38 = arith.constant dense<0.000000e+00> : vector<16x32xf32>
    %133 = tpu.matmul %130, %132, %cst_38 {dimension_numbers = #tpu.dot_dimension_numbers<[1], [0], [0], [1], [0, 0, 1, 1], [], []>} : vector<16x64xf32>, vector<64x32xf32>, vector<16x32xf32> -> vector<16x32xf32>
    %134 = vector.broadcast %16 : vector<1x32xf32> to vector<16x32xf32>
    %135 = arith.addf %133, %134 : vector<16x32xf32>
    %136 = arith.addf %101, %135 : vector<16x32xf32>
    %c0_39 = arith.constant 0 : index
    %c0_40 = arith.constant 0 : index
    %137 = vector.load %arg6[%c0_39, %c0_40] : memref<16x32xf32, #tpu.memory_space<vmem>>, vector<16x32xf32>
    tpu.vector_store %arg6[%c0_39, %c0_40], %136 {strides = array<i32>} : memref<16x32xf32, #tpu.memory_space<vmem>>, vector<16x32xf32>,
    %c5_i32 = arith.constant 5 : i32
    %138 = arith.cmpi eq, %arg0, %c5_i32 : i32
    %139 = arith.extui %138 : i1 to i32
    %c0_i32_41 = arith.constant 0 : i32
    %140 = arith.cmpi ne, %139, %c0_i32_41 : i32
    scf.if %140 {
      %c0_42 = arith.constant 0 : index
      %c0_43 = arith.constant 0 : index
      %141 = vector.load %arg5[%c0_42, %c0_43] : memref<8x128xf32, #tpu.memory_space<vmem>>, vector<1x32xf32>
      %c1 = arith.constant 1 : index
      %c0_44 = arith.constant 0 : index
      %142 = vector.load %arg5[%c1, %c0_44] : memref<8x128xf32, #tpu.memory_space<vmem>>, vector<1x32xf32>
      %cst_45 = arith.constant dense<0.000000e+00> : vector<16xf32>
      %143 = vector.multi_reduction <add>, %136, %cst_45 [1] : vector<16x32xf32> to vector<16xf32>
      %144 = vector.shape_cast %143 : vector<16xf32> to vector<16x1xf32>
      %cst_46 = arith.constant 3.200000e+01 : f32
      %145 = vector.broadcast %cst_46 : f32 to vector<16x1xf32>
      %146 = arith.divf %144, %145 : vector<16x1xf32>
      %147 = vector.broadcast %146 : vector<16x1xf32> to vector<16x32xf32>
      %148 = arith.subf %136, %147 : vector<16x32xf32>
      %149 = arith.mulf %148, %148 : vector<16x32xf32>
      %cst_47 = arith.constant dense<0.000000e+00> : vector<16xf32>
      %150 = vector.multi_reduction <add>, %149, %cst_47 [1] : vector<16x32xf32> to vector<16xf32>
      %151 = vector.shape_cast %150 : vector<16xf32> to vector<16x1xf32>
      %cst_48 = arith.constant 3.200000e+01 : f32
      %152 = vector.broadcast %cst_48 : f32 to vector<16x1xf32>
      %153 = arith.divf %151, %152 : vector<16x1xf32>
      %154 = vector.broadcast %146 : vector<16x1xf32> to vector<16x32xf32>
      %155 = arith.subf %136, %154 : vector<16x32xf32>
      %cst_49 = arith.constant 9.99999996E-13 : f32
      %156 = vector.broadcast %cst_49 : f32 to vector<16x1xf32>
      %157 = arith.addf %153, %156 : vector<16x1xf32>
      %158 = math.rsqrt %157 : vector<16x1xf32>
      %159 = vector.broadcast %158 : vector<16x1xf32> to vector<16x32xf32>
      %160 = arith.mulf %155, %159 : vector<16x32xf32>
      %161 = vector.broadcast %141 : vector<1x32xf32> to vector<16x32xf32>
      %162 = arith.mulf %160, %161 : vector<16x32xf32>
      %163 = vector.broadcast %142 : vector<1x32xf32> to vector<16x32xf32>
      %164 = arith.addf %162, %163 : vector<16x32xf32>
      %c0_50 = arith.constant 0 : index
      %c0_51 = arith.constant 0 : index
      %165 = vector.load %arg6[%c0_50, %c0_51] : memref<16x32xf32, #tpu.memory_space<vmem>>, vector<16x32xf32>
      tpu.vector_store %arg6[%c0_50, %c0_51], %164 {strides = array<i32>} : memref<16x32xf32, #tpu.memory_space<vmem>>, vector<16x32xf32>,
    } else {
    }
    return
  }
  func.func @transform_0(%arg0: i32) -> (i32, i32) {
    %c0_i32 = arith.constant 0 : i32
    %c0_i32_0 = arith.constant 0 : i32
    %c0_i32_1 = arith.constant 0 : i32
    return %c0_i32, %c0_i32_0 : i32, i32
  }
  func.func @transform_1(%arg0: i32) -> (i32, i32, i32) {
    %c0_i32 = arith.constant 0 : i32
    %c0_i32_0 = arith.constant 0 : i32
    %c0_i32_1 = arith.constant 0 : i32
    %c0_i32_2 = arith.constant 0 : i32
    return %c0_i32, %c0_i32_0, %c0_i32_1 : i32, i32, i32
  }
  func.func @transform_2(%arg0: i32) -> (i32, i32, i32) {
    %c0_i32 = arith.constant 0 : i32
    %c0_i32_0 = arith.constant 0 : i32
    %c0_i32_1 = arith.constant 0 : i32
    return %arg0, %c0_i32, %c0_i32_0 : i32, i32, i32
  }
  func.func @transform_3(%arg0: i32) -> (i32, i32, i32) {
    %c0_i32 = arith.constant 0 : i32
    %c0_i32_0 = arith.constant 0 : i32
    %c0_i32_1 = arith.constant 0 : i32
    return %arg0, %c0_i32, %c0_i32_0 : i32, i32, i32
  }
  func.func @transform_4(%arg0: i32) -> (i32, i32) {
    %c0_i32 = arith.constant 0 : i32
    %c0_i32_0 = arith.constant 0 : i32
    %c0_i32_1 = arith.constant 0 : i32
    return %c0_i32, %c0_i32_0 : i32, i32
  }
  func.func @transform_5(%arg0: i32) -> (i32, i32) {
    %c0_i32 = arith.constant 0 : i32
    %c0_i32_0 = arith.constant 0 : i32
    %c0_i32_1 = arith.constant 0 : i32
    return %c0_i32, %c0_i32_0 : i32, i32
  }
}

</mosaic_0001>

<bundles_post_ra>
// kernel: encoder_layers.1
= control target key start
LH: loop header
LB: loop body
LE: loop exit
PB: predicated region body
PF: predicated region fallthrough
CT: control target
= control target key end

     0   :  { %s2402_s0 = inlined_call_operand.hbm [shape: f32[16,32], index: 0, kind: input, shape index: {}]   ;;  %s2403_s1 = inlined_call_operand.hbm [shape: f32[2,1,8], index: 1, kind: input, shape index: {}]   ;;  %s2404_s2 = inlined_call_operand.hbm [shape: f32[6,64,512], index: 2, kind: input, shape index: {}]   ;;  %s2405_s3 = inlined_call_operand.hbm [shape: f32[6,8,128], index: 3, kind: input, shape index: {}]   ;;  %s2406_s4 = inlined_call_operand.hbm [shape: f32[8,128], index: 4, kind: input, shape index: {}]   ;;  %s2407_s5 = inlined_call_operand.hbm [shape: f32[16,32], index: 5, kind: output, shape index: {}]  }
   0x1   :  { %2408 = sst [smem:[#allocation16_spill]] %s2402_s0 }
   0x2   :  { %2409 = sst [smem:[#allocation17_spill]] %s2403_s1 }
   0x3   :  { %10 = vsyncpa [#allocation3], 0 }
   0x4   :  { %11 = vsyncpa [#allocation6], 0 }
   0x5   :  { %12 = vsyncpa [#allocation4], 0  ;;  %s1946_s18 = smov 0   ;;  %s1948_s19 = smov 0  }
   0x6   :  { %s1950_s20 = smov 0   ;;  %s1952_s21 = smov 0  }
   0x7 LB: > { %s1965_s22 = sadd.s32 4294967295, %s1893_s21   ;;  %p80_p0 = scmp.ne.s32.totalorder %s1885_s19, %s1881_s18  ;;  %s1893_s21 = sphi %s1952_s21, %s2426_s21   ;;  %s1889_s20 = sphi %s1950_s20, %s2425_s20   ;;  %s1885_s19 = sphi %s1948_s19, %s2424_s19   ;;  %s1881_s18 = sphi %s1946_s18, %s2423_s18  }
   0x8   : > { %p81_p1 = scmp.eq.s32.totalorder %s1965_s22, 0  ;;  %p1448_p2 = scmp.ge.s32.totalorder %s1893_s21, 1 }
   0x9   : > { %p159_p3 = scmp.lt.s32.totalorder %s1893_s21, 7  ;;  %p1449_p4 = scmp.ne.s32.totalorder %s1965_s22, 0 }
   0xa   : > { %p1974_p5 = por %p81_p1, %p80_p0  ;;  %s2411_s0 = sld [smem:[#allocation16_spill]] }
   0xb   : > { %p1981_p6 = pnand %p1448_p2, %p159_p3  ;;  %s1895_s28 = smov [#allocation2]  }
   0xc   : > { %s172_s29 = sshll.u32 %s1895_s28, 4  ;;  %s2414_s1 = sld [smem:[#allocation17_spill]]  ;;  %s173_s29 = int_to_ptr.vmem [resolvable:$true] %s172_s29 }
   0xd   : > { %p1523_p7 = pneg %p1981_p6  ;;  %s1896_s9 = smov 128  }
   0xe   : > { %s1897_s10 = smov 8   ;;  %s1898_s11 = smov [#allocation5]  }
   0xf   : > { %p1989_p8 = pnand %p1523_p7, %p81_p1  ;;  %s186_s12 = sshll.u32 %s1898_s11, 4  ;;  %s187_s12 = int_to_ptr.vmem [resolvable:$true] %s186_s12 }
  0x10   : > { %s170_s26 = sshll.u32 %s2411_s0, 4  ;;  %s1899_s13 = smov 16   ;;  %s171_s26 = int_to_ptr.hbm [resolvable:$true] %s170_s26 }
  0x11   : > { %1526 = dma.hbm_to_vmem [thread:$0]  (!%p1989_p8), %s171_s26, 256, %s173_s29, [#allocation3], %s1896_s9, %s1896_s9, %s1897_s10  }
  0x12   : > { %s184_s8 = sshll.u32 %s2414_s1, 4  ;;  %s1900_s14 = smov 1   ;;  %s185_s8 = int_to_ptr.hbm [resolvable:$true] %s184_s8 }
  0x13   : > { %1529 = dma.hbm_to_vmem [thread:$0]  (!%p1989_p8), %s185_s8, 32, %s187_s12, [#allocation6], %s1899_s13, %s1899_s13, %s1900_s14  }
  0x14   : > { %s2001_s15 = sadd.s32 1, %s1893_s21   ;;  %s67_s17 = sadd.s32 1, %s1889_s20 }
  0x15   : > { %s64_s16 = ssub.s32 %s1893_s21, %s2001_s15  ;;  %p74_p10 = scmp.ne.s32.totalorder %s1889_s20, %s1885_s19 }
  0x16   : > { %p65_p9 = scmp.eq.s32.totalorder %s64_s16, 0  ;;  %p75_p11 = scmp.eq.s32.totalorder %s1893_s21, 0 }
  0x17   : > { %p1543_p13 = scmp.lt.s32.totalorder %s1893_s21, 6  ;;  %s212_s24 = sand.u32 1, %s1893_s21  }
  0x18   : > { %s2010_s18 = scalar_select %p65_p9, %s1889_s20, %s67_s17  }
  0x19   : > { %p76_p12 = por %p75_p11, %p74_p10  ;;  %s214_s25 = sand.u32 1, %s1889_s20  }
  0x1a   : > { %s1453_s26 = sshll.u32 %s214_s25, 8  ;;  %s1502_s28 = sshll.u32 %s1893_s21, 8 }
  0x1b   : > { %s221_s7 = scalar_lea.hbm %s2404_s2, %s1502_s28  ;;  %s216_s8 = scalar_lea.vmem [#allocation7], %s1453_s26 }
  0x1c   : > { %s224_s9 = sshll.u32 %s216_s8, 4  ;;  %s222_s10 = sshll.u32 %s221_s7, 4  ;;  %s225_s9 = int_to_ptr.vmem [resolvable:$true] %s224_s9  ;;  %s223_s10 = int_to_ptr.hbm [resolvable:$true] %s222_s10 }
  0x1d   : > { %p2021_p0 = pnand %p1543_p13, %p76_p12  ;;  %s199_s14 = sshll.u32 %s2406_s4, 4  ;;  %s200_s14 = int_to_ptr.hbm [resolvable:$true] %s199_s14 }
  0x1e   : > { %s2028_s16 = scalar_lea.sflag [#allocation3], %s212_s24  ;;  %s1725_s17 = sshra.s32 %s223_s10, 4  ;;  %s1726_s17 = int_to_ptr.hbm [resolvable:$true] %s1725_s17 }
  0x1f   : > { %s1727_s28 = scalar_lea.hbm %s1726_s17, 256  ;;  %p1729_p3 = pneg %p2021_p0 }
  0x20   : > { %p1728_p2 = scmp.ne.s32.totalorder %s1726_s17, %s1727_s28  ;;  %s1732_s6 = scalar_lea.hbm %s2404_s2, 1536 }
  0x21   : > { %p1733_p10 = scmp.lt.s32.totalorder %s1726_s17, %s2404_s2  ;;  %p1734_p11 = scmp.lt.s32.totalorder %s1732_s6, %s1727_s28 }
  0x22   : > { %p1730_p7 = pnand %p1729_p3, %p1728_p2 }
  0x23   : > { %p1735_p12 = por %p1734_p11, %p1733_p10 }
  0x24   : > { %p1731_p9 = pneg %p1730_p7 }
  0x26   : > { %p1736_p13 = pnand %p1735_p12, %p1731_p9 }
  0x28   : > { %1739 = shalt.err (!%p1736_p13)
}
  0x29   : > { %s1901_s24 = smov 512   ;;  %s1902_s12 = smov 32  }
  0x2a   : > { %1536 = dma.hbm_to_vmem [thread:$0]  (!%p2021_p0), %s223_s10, 4096, %s225_s9, %s2028_s16, %s1901_s24, %s1901_s24, %s1902_s12  }
  0x2b   : > { %s1903_s13 = smov [#allocation9]   ;;  %s1456_s29 = sshll.u32 %s214_s25, 3 }
  0x2c   : > { %s201_s26 = sshll.u32 %s1903_s13, 4  ;;  %s1457_s17 = sshll.u32 %s1893_s21, 3  ;;  %s202_s26 = int_to_ptr.vmem [resolvable:$true] %s201_s26 }
  0x2d   : > { %1532 = dma.hbm_to_vmem [thread:$0]  (!%p1989_p8), %s200_s14, 128, %s202_s26, [#allocation6]  }
  0x2e   : > { %s238_s28 = scalar_lea.vmem [#allocation8], %s1456_s29  ;;  %s242_s0 = scalar_lea.hbm %s2405_s3, %s1457_s17 }
  0x2f   : > { %s246_s6 = sshll.u32 %s238_s28, 4  ;;  %s244_s1 = sshll.u32 %s242_s0, 4  ;;  %s247_s6 = int_to_ptr.vmem [resolvable:$true] %s246_s6  ;;  %s245_s1 = int_to_ptr.hbm [resolvable:$true] %s244_s1 }
  0x30   : > { %s1785_s9 = sshra.s32 %s245_s1, 4  ;;  %s1792_s21 = scalar_lea.hbm %s2405_s3, 48  ;;  %s1786_s9 = int_to_ptr.hbm [resolvable:$true] %s1785_s9 }
  0x31   : > { %s1787_s10 = scalar_lea.hbm %s1786_s9, 8  ;;  %p1793_p8 = scmp.lt.s32.totalorder %s1786_s9, %s2405_s3 }
  0x32   : > { %p1788_p2 = scmp.ne.s32.totalorder %s1786_s9, %s1787_s10  ;;  %p1794_p10 = scmp.lt.s32.totalorder %s1792_s21, %s1787_s10 }
  0x34   : > { %p1790_p7 = pnand %p1788_p2, %p1729_p3  ;;  %p1795_p11 = por %p1794_p10, %p1793_p8 }
  0x36   : > { %p1791_p9 = pneg %p1790_p7 }
  0x38   : > { %p1796_p12 = pnand %p1795_p11, %p1791_p9 }
  0x3a   : > { %1799 = shalt.err (!%p1796_p12)
}
  0x3b   : > { %1539 = dma.hbm_to_vmem [thread:$0]  (!%p2021_p0), %s245_s1, 128, %s247_s6, %s2028_s16  }
  0x3c   : > { %255 = sbr.rel (%p1981_p6) target bundleno = 2338 (0x922), region = 40 }
  0x41   : > { %1860 = dma.done.wait (%p81_p1), [#allocation3], 256  }
  0x42   : > { %1862 = vsyncadd (%p81_p1), [#allocation3], 4294967040 }
  0x43   : > { %1864 = dma.done.wait (%p81_p1), [#allocation6], 32  }
  0x44   : > { %1866 = vsyncadd (%p81_p1), [#allocation6], 4294967264  ;;  %s267_s0 = sand.u32 1, %s1965_s22   ;;  %s269_s1 = sand.u32 1, %s1885_s19  }
  0x45   : > { %s1461_s11 = sshll.u32 %s269_s1, 8  ;;  %s268_s27 = scalar_lea.sflag [#allocation3], %s267_s0 }
  0x46   : > { %s2076_s16 = scalar_lea.vmem [#allocation7], %s1461_s11 }
  0x47   : > { %1868 = dma.done.wait (%p1974_p5), %s268_s27, 4224  }
  0x48   : > { %1870 = vsyncadd (%p1974_p5), %s268_s27, 4294963072  ;;  %s2082_s12 = sshll.u32 %s269_s1, 3 }
  0x49   : > { %s281_s13 = scalar_lea.vmem [#allocation8], %s2082_s12 }
  0x4a   : > { %1872 = dma.done.wait (%p81_p1), [#allocation6], 128  }
  0x4b   : > { %1874 = vsyncadd (%p81_p1), [#allocation6], 4294967168  ;;  %317 = sbr.rel (%p1449_p4) target bundleno = 83 (0x53), region = 64 }
  0x50   : > { %v318_v0 = vld [vmem:[#allocation2] sm:$0xff]  ;;  %vm320_vm0 = vcmask 261120   ;;  %v319_v1 = vld [vmem:[#allocation2 + $0x8] sm:$0xff] }
  0x51   : > { %321 = vst.msk [vmem:[#allocation10] sm:$0xff] %vm320_vm0, %v318_v0 }
  0x52   : > { %322 = vst.msk [vmem:[#allocation10 + $0x8] sm:$0xff] %vm320_vm0, %v319_v1 }
  0x53 PF: > { %vm330_vm1 = vcmask 261120   ;;  %v1904_v6 = vmov 32.0   ;;  %v391_v23 = vld [vmem:[%s2076_s16 + $0x60] sm:$0xff]  ;;  %s1905_s23 = smov 120   ;;  %s1906_s26 = smov 112   ;;  %vm454_vm9 = vcmask 64512  }
  0x54   : > { %1617 = vrcp.f32 %v1904_v6  ;;  %411 = vmatpush.msra.mxu0 %v391_v23  ;;  %v390_v24 = vld [vmem:[%s2076_s16 + $0x40] sm:$0xff]  ;;  %s1907_s29 = smov 104   ;;  %s1908_s17 = smov 96   ;;  %v1909_v23 = vmov 0  }
  0x55   : > { %v389_v25 = vld [vmem:[%s2076_s16 + $0x20] sm:$0xff]  ;;  %s1910_s28 = smov 64   ;;  %s1911_s6 = smov 8  }
  0x56   : > { %412 = vmatpush.msra.mxu0 %v390_v24  ;;  %v388_v26 = vld [vmem:[%s2076_s16] sm:$0xff]  ;;  %s1912_s7 = smov 16   ;;  %s1913_s8 = smov 24  }
  0x57   : > { %v2115_v38 = vld [vmem:[%s281_s13] sm:$0xff]  ;;  %p1497_p1 = scmp.ne.s32.totalorder %s1965_s22, 5 }
  0x58   : > { %v2091_v2 = vld [vmem:[#allocation10] sm:$0xff]  ;;  %413 = vmatpush.msra.mxu0 %v389_v25  ;;  %v382_v42 = vperm.slane %v2115_v38, 0  ;;  %v385_v46 = vperm.slane %v2115_v38, 1  ;;  %v392_v56 = vperm.slane %v2115_v38, 4 }
  0x59   : > { %v331_v3 = vsel %vm330_vm1, %v2091_v2, 0.0  ;;  %v2095_v4 = vld [vmem:[#allocation10 + $0x8] sm:$0xff] }
  0x5a   : > { %332 = vadd.xlane.f32.xlu0 %v331_v3  ;;  %v334_v5 = vsel %vm330_vm1, %v2095_v4, 0.0  ;;  %v1618_v7 = vpop.eup %1617  ;;  %414 = vmatpush.msra.mxu0 %v388_v26 }
  0x5b   : > { %v338_v8 = vmul.f32 32.0, %v1618_v7  ;;  %vm342_vm2 = vweird.f32 %v1618_v7 }
  0x5d   : > { %v339_v9 = vsub.f32 1.0, %v338_v8 }
  0x5f   : > { %v340_v10 = vmul.f32 %v1618_v7, %v339_v9 }
  0x61   : > { %v341_v11 = vadd.f32 %v1618_v7, %v340_v10 }
  0x62   : > { %335 = vadd.xlane.f32.xlu0 %v334_v5 }
  0x63   : > { %v2099_v12 = vsel %vm342_vm2, %v1618_v7, %v341_v11 }
  0xcd   : > { %v333_v13 = vpop.xlane.xlu0 %332 }
  0xce   : > { %v344_v14 = vmul.f32 %v2099_v12, %v333_v13 }
  0xd0   : > { %v346_v15 = vsub.f32 %v2091_v2, %v344_v14 }
  0xd2   : > { %v348_v16 = vmul.f32 %v346_v15, %v346_v15 }
  0xd4   : > { %v350_v17 = vsel %vm330_vm1, %v348_v16, 0.0 }
  0xd5   : > { %351 = vadd.xlane.f32.xlu1 %v350_v17  ;;  %v336_v18 = vpop.xlane.xlu0 %335 }
  0xd6   : > { %v345_v19 = vmul.f32 %v2099_v12, %v336_v18 }
  0xd8   : > { %v347_v20 = vsub.f32 %v2095_v4, %v345_v19 }
  0xda   : > { %v349_v21 = vmul.f32 %v347_v20, %v347_v20 }
  0xdc   : > { %v353_v22 = vsel %vm330_vm1, %v349_v21, 0.0  ;;  %v325_v21 = vld [vmem:[#allocation5] sm:$0x1] }
  0xdd   : > { %354 = vadd.xlane.f32.xlu1 %v353_v22  ;;  %vm327_vm10 = vcmp.gt.f32.partialorder %v325_v21, 0.0 }
  0xde   : > { %v661_v24 = vsel %vm327_vm10, 1, %v1909_v23 }
  0xdf   : > { %v663_v25 = vperm.slane %v661_v24, 0 }
  0xe1   : > { %vm2176_vm11 = vcmp.eq.s32.totalorder %v663_v25, 1 }
 0x148   : > { %v352_v27 = vpop.xlane.xlu1 %351 }
 0x149   : > { %v356_v28 = vmul.f32 %v352_v27, %v2099_v12 }
 0x14b   : > { %v358_v29 = vadd.f32 1e-12, %v356_v28 }
 0x14d   : > { %1619 = vrsqrt.f32 %v358_v29  ;;  %vm366_vm4 = vweird.f32 %v358_v29 }
 0x150   : > { %v355_v30 = vpop.xlane.xlu1 %354 }
 0x151   : > { %v357_v31 = vmul.f32 %v355_v30, %v2099_v12 }
 0x153   : > { %v1620_v32 = vpop.eup %1619  ;;  %v359_v33 = vadd.f32 1e-12, %v357_v31  ;;  %v326_v31 = vld [vmem:[#allocation5 + $0x1] sm:$0x1] }
 0x154   : > { %v361_v34 = vmul.f32 %v1620_v32, %v358_v29  ;;  %vm367_vm3 = vweird.f32 %v1620_v32  ;;  %vm328_vm12 = vcmp.gt.f32.partialorder %v326_v31, 0.0 }
 0x155   : > { %1621 = vrsqrt.f32 %v359_v33  ;;  %vm368_vm5 = vmor %vm366_vm4, %vm367_vm3  ;;  %vm376_vm7 = vweird.f32 %v359_v33 }
 0x156   : > { %v362_v35 = vmul.f32 %v1620_v32, %v361_v34 }
 0x158   : > { %v363_v36 = vmul.f32 0.5, %v362_v35 }
 0x15a   : > { %v364_v37 = vsub.f32 1.5, %v363_v36 }
 0x15b   : > { %v1622_v39 = vpop.eup %1621 }
 0x15c   : > { %v365_v40 = vmul.f32 %v1620_v32, %v364_v37  ;;  %v371_v41 = vmul.f32 %v1622_v39, %v359_v33  ;;  %vm377_vm6 = vweird.f32 %v1622_v39 }
 0x15d   : > { %vm378_vm8 = vmor %vm376_vm7, %vm377_vm6 }
 0x15e   : > { %v369_v43 = vsel %vm368_vm5, %v1620_v32, %v365_v40  ;;  %v372_v44 = vmul.f32 %v1622_v39, %v371_v41  ;;  %v662_v32 = vsel %vm328_vm12, 1, %v1909_v23 }
 0x15f   : > { %v380_v45 = vmul.f32 %v369_v43, %v346_v15  ;;  %v664_v33 = vperm.slane %v662_v32, 0 }
 0x160   : > { %v373_v47 = vmul.f32 0.5, %v372_v44 }
 0x161   : > { %v383_v48 = vmul.f32 %v382_v42, %v380_v45  ;;  %vm2186_vm13 = vcmp.eq.s32.totalorder %v664_v33, 1 }
 0x162   : > { %v374_v49 = vsub.f32 1.5, %v373_v47 }
 0x163   : > { %v386_v50 = vadd.f32 %v385_v46, %v383_v48 }
 0x164   : > { %v375_v51 = vmul.f32 %v1622_v39, %v374_v49 }
 0x165   : > { %1465 = vmatmul.msk.f32.vlgmr.msra.gmra.mxu0 %vm330_vm1, %v386_v50 }
 0x166   : > { %v379_v52 = vsel %vm378_vm8, %v1622_v39, %v375_v51 }
 0x167   : > { %v381_v53 = vmul.f32 %v379_v52, %v347_v20 }
 0x169   : > { %v384_v54 = vmul.f32 %v382_v42, %v381_v53 }
 0x16b   : > { %v387_v55 = vadd.f32 %v385_v46, %v384_v54 }
 0x16d   : > { %1466 = vmatmul.msk.f32.gmra.mxu0 %vm330_vm1, %v387_v55 }
 0x1e2   : > { %v416_v57 = vpop.f32.mrf.mxu0 }
 0x1e3   : > { %v2122_v58 = vadd.f32 %v416_v57, %v392_v56 }
 0x1e5   : > { %440 = vrot.lane.b32.xlu2 %v2122_v58, %s1905_s23  ;;  %v422_v61 = vmul.f32 0.35355338, %v2122_v58 }
 0x1ea   : > { %v419_v59 = vpop.f32.mrf.mxu0 }
 0x1eb   : > { %v2125_v60 = vadd.f32 %v419_v59, %v392_v56 }
 0x1ed   : > { %444 = vrot.lane.b32.xlu2 %v2122_v58, %s1906_s26  ;;  %450 = vrot.lane.b32.xlu1 %v2125_v60, %s1907_s29  ;;  %v423_v62 = vmul.f32 0.35355338, %v2125_v60 }
 0x1ee   : > { %442 = vrot.lane.b32.xlu0 %v2125_v60, %s1905_s23 }
 0x1f5   : > { %448 = vrot.lane.b32.xlu2 %v2122_v58, %s1907_s29 }
 0x1f6   : > { %479 = vrot.lane.b32.xlu0 %v2125_v60, %s1908_s17 }
 0x1fd   : > { %446 = vrot.lane.b32.xlu2 %v2125_v60, %s1906_s26 }
 0x1fe   : > { %426 = vrot.lane.b32.xlu0 %v422_v61, %s1905_s23 }
 0x205   : > { %452 = vrot.lane.b32.xlu2 %v2122_v58, %s1908_s17 }
 0x206   : > { %428 = vrot.lane.b32.xlu0 %v423_v62, %s1905_s23 }
 0x20d   : > { %430 = vrot.lane.b32.xlu2 %v422_v61, %s1906_s26 }
 0x23f   : > { %v2138_v63 = vpop.permute.xlu2 %440 }
 0x240   : > { %505 = vrot.lane.b32.xlu2 %v2138_v63, %s1908_s17  ;;  %v1602_v57 = vpack.i.bf16 %v2138_v63, %v2122_v58 }
 0x247   : > { %v2141_v0 = vpop.permute.xlu2 %444 }
 0x248   : > { %557 = vrot.lane.b32.xlu1 %v2141_v0, %s1908_s17 }
 0x24f   : > { %v2144_v1 = vpop.permute.xlu2 %448 }
 0x250   : > { %609 = vrot.lane.b32.xlu0 %v2144_v1, %s1908_s17 }
 0x257   : > { %v2147_v3 = vpop.permute.xlu2 %446 }
 0x258   : > { %432 = vrot.lane.b32.xlu0 %v423_v62, %s1906_s26 }
 0x25f   : > { %v453_v5 = vpop.permute.xlu2 %452  ;;  %v2149_v6 = vpop.permute.xlu1 %450 }
 0x260   : > { %v2151_v7 = vpop.permute.xlu0 %442  ;;  %1467 = vmatpush.xpose.msk.msra.mxu2 %vm454_vm9, %v453_v5  ;;  %635 = vrot.lane.b32.xlu2 %v2149_v6, %s1908_s17 }
 0x261   : > { %v1607_v8 = vpack.i.bf16 %v2151_v7, %v2141_v0  ;;  %531 = vrot.lane.b32.xlu1 %v2151_v7, %s1908_s17 }
 0x263   : > { %1468 = vmatmul.msk.f32.vlgmr.msra.gmra.mxu2 %vm454_vm9, %v422_v61 }
 0x267   : > { %v431_v10 = vpop.permute.xlu2 %430 }
 0x268   : > { %v480_v9 = vpop.permute.xlu0 %479  ;;  %583 = vrot.lane.b32.xlu2 %v2147_v3, %s1908_s17 }
 0x269   : > { %1469 = vmatpush.xpose.msk.msrb.mxu2 %vm454_vm9, %v480_v9  ;;  %436 = vrot.lane.b32.xlu1 %v423_v62, %s1907_s29 }
 0x26c   : > { %1470 = vmatmul.msk.f32.vlgmr.msrb.gmra.mxu2 %vm454_vm9, %v423_v62 }
 0x270   : > { %v427_v13 = vpop.permute.xlu0 %426 }
 0x271   : > { %434 = vrot.lane.b32.xlu1 %v422_v61, %s1907_s29 }
 0x278   : > { %v429_v14 = vpop.permute.xlu0 %428 }
 0x29a   : > { %v506_v11 = vpop.permute.xlu2 %505 }
 0x29b   : > { %1471 = vmatpush.xpose.msk.msra.mxu3 %vm454_vm9, %v506_v11 }
 0x29e   : > { %1472 = vmatmul.msk.f32.vlgmr.msra.gmra.mxu3 %vm454_vm9, %v427_v13 }
 0x2ba   : > { %v636_v15 = vpop.permute.xlu2 %635  ;;  %v558_v16 = vpop.permute.xlu1 %557 }
 0x2bb   : > { %1475 = vmatpush.xpose.msk.msra.mxu2 %vm454_vm9, %v558_v16 }
 0x2be   : > { %1476 = vmatmul.msk.f32.vlgmr.msra.gmra.mxu2 %vm454_vm9, %v431_v10 }
 0x2bf   : > { %1481 = vmatpush.xpose.msk.msrb.mxu2 %vm454_vm9, %v636_v15 }
 0x2c2   : > { %v584_v17 = vpop.permute.xlu2 %583  ;;  %v610_v18 = vpop.permute.xlu0 %609 }
 0x2c3   : > { %1477 = vmatpush.xpose.msk.msrb.mxu3 %vm454_vm9, %v584_v17 }
 0x2ca   : > { %v433_v19 = vpop.permute.xlu0 %432 }
 0x2cb   : > { %1478 = vmatmul.msk.f32.vlgmr.msrb.gmra.mxu3 %vm454_vm9, %v433_v19 }
 0x2d3   : > { %v532_v20 = vpop.permute.xlu1 %531 }
 0x2d4   : > { %1473 = vmatpush.xpose.msk.msra.mxu1 %vm454_vm9, %v532_v20 }
 0x2d7   : > { %1474 = vmatmul.msk.f32.vlgmr.msra.gmra.mxu1 %vm454_vm9, %v429_v14 }
 0x2d8   : > { %1479 = vmatpush.xpose.msk.msrb.mxu1 %vm454_vm9, %v610_v18 }
 0x2db   : > { %v437_v22 = vpop.permute.xlu1 %436 }
 0x2dc   : > { %1482 = vmatmul.msk.f32.vlgmr.msrb.gmra.mxu2 %vm454_vm9, %v437_v22 }
 0x2e3   : > { %v435_v26 = vpop.permute.xlu1 %434 }
 0x2e4   : > { %1480 = vmatmul.msk.f32.vlgmr.msrb.gmra.mxu1 %vm454_vm9, %v435_v26 }
 0x2e6   : > { %v476_v28 = vpop.f32.mrf.mxu2 }
 0x2e7   : > { %v667_v29 = vsel %vm2176_vm11, %v476_v28, -3.4028235e+38 }
 0x2e8   : > { %v675_v30 = vsel %vm454_vm9, %v667_v29, -inf }
 0x2e9   : > { %676 = vmax.xlane.f32.xlu2 %v675_v30 }
 0x2ef   : > { %v502_v37 = vpop.f32.mrf.mxu2 }
 0x2f0   : > { %v668_v40 = vsel %vm2186_vm13, %v502_v37, -3.4028235e+38 }
 0x2f1   : > { %v678_v41 = vsel %vm454_vm9, %v668_v40, -inf }
 0x321   : > { %v528_v34 = vpop.f32.mrf.mxu3 }
 0x322   : > { %v669_v35 = vsel %vm2176_vm11, %v528_v34, -3.4028235e+38 }
 0x323   : > { %v681_v36 = vsel %vm454_vm9, %v669_v35, -inf }
 0x324   : > { %682 = vmax.xlane.f32.xlu1 %v681_v36 }
 0x32c   : > { %679 = vmax.xlane.f32.xlu1 %v678_v41 }
 0x341   : > { %v580_v42 = vpop.f32.mrf.mxu2 }
 0x342   : > { %v671_v43 = vsel %vm2176_vm11, %v580_v42, -3.4028235e+38 }
 0x343   : > { %v687_v44 = vsel %vm454_vm9, %v671_v43, -inf }
 0x344   : > { %688 = vmax.xlane.f32.xlu0 %v687_v44 }
 0x34e   : > { %v606_v45 = vpop.f32.mrf.mxu3 }
 0x34f   : > { %v672_v46 = vsel %vm2186_vm13, %v606_v45, -3.4028235e+38 }
 0x350   : > { %v690_v47 = vsel %vm454_vm9, %v672_v46, -inf }
 0x351   : > { %691 = vmax.xlane.f32.xlu1 %v690_v47 }
 0x354   : > { %v554_v48 = vpop.f32.mrf.mxu1 }
 0x355   : > { %v670_v49 = vsel %vm2186_vm13, %v554_v48, -3.4028235e+38 }
 0x356   : > { %v684_v50 = vsel %vm454_vm9, %v670_v49, -inf }
 0x357   : > { %685 = vmax.xlane.f32.xlu2 %v684_v50 }
 0x35c   : > { %v677_v59 = vpop.xlane.xlu2 %676 }
 0x35d   : > { %v699_v61 = vsub.f32 %v667_v29, %v677_v59 }
 0x35f   : > { %v658_v51 = vpop.f32.mrf.mxu2  ;;  %v707_v62 = vmul.f32 1.442695, %v699_v61 }
 0x360   : > { %v674_v52 = vsel %vm2186_vm13, %v658_v51, -3.4028235e+38 }
 0x361   : > { %v632_v53 = vpop.f32.mrf.mxu1  ;;  %v696_v54 = vsel %vm454_vm9, %v674_v52, -inf  ;;  %1623 = vpow2.f32 %v707_v62 }
 0x362   : > { %v673_v55 = vsel %vm2176_vm11, %v632_v53, -3.4028235e+38  ;;  %697 = vmax.xlane.f32.xlu2 %v696_v54 }
 0x363   : > { %v693_v56 = vsel %vm454_vm9, %v673_v55, -inf }
 0x364   : > { %694 = vmax.xlane.f32.xlu0 %v693_v56 }
 0x367   : > { %v2215_v9 = vpop.eup %1623 }
 0x368   : > { %v723_v58 = vsel %vm454_vm9, %v2215_v9, 0.0 }
 0x378   : > { %1608 = vrot.lane.b32.xlu0 %v1607_v8, %s1910_s28 }
 0x37a   : > { %1603 = vrot.lane.b32.xlu2 %v1602_v57, %s1910_s28 }
 0x397   : > { %v683_v5 = vpop.xlane.xlu1 %682 }
 0x398   : > { %v701_v63 = vsub.f32 %v669_v35, %v683_v5 }
 0x39a   : > { %v711_v0 = vmul.f32 1.442695, %v701_v63 }
 0x39f   : > { %v680_v10 = vpop.xlane.xlu1 %679 }
 0x3a0   : > { %v700_v11 = vsub.f32 %v668_v40, %v680_v10 }
 0x3a2   : > { %v709_v13 = vmul.f32 1.442695, %v700_v11  ;;  %724 = vadd.xlane.f32.xlu0 %v723_v58 }
 0x3a4   : > { %1625 = vpow2.f32 %v709_v13 }
 0x3a5   : > { %1627 = vpow2.f32 %v711_v0 }
 0x3aa   : > { %v2219_v7 = vpop.eup %1625 }
 0x3ab   : > { %v726_v8 = vsel %vm454_vm9, %v2219_v7, 0.0  ;;  %v2223_v14 = vpop.eup %1627 }
 0x3ac   : > { %727 = vadd.xlane.f32.xlu2 %v726_v8  ;;  %v729_v15 = vsel %vm454_vm9, %v2223_v14, 0.0 }
 0x3b4   : > { %730 = vadd.xlane.f32.xlu2 %v729_v15 }
 0x3b7   : > { %v689_v16 = vpop.xlane.xlu0 %688 }
 0x3b8   : > { %v703_v17 = vsub.f32 %v671_v43, %v689_v16 }
 0x3ba   : > { %v715_v18 = vmul.f32 1.442695, %v703_v17 }
 0x3bc   : > { %1629 = vpow2.f32 %v715_v18 }
 0x3c2   : > { %v2227_v19 = vpop.eup %1629 }
 0x3c3   : > { %v735_v20 = vsel %vm454_vm9, %v2227_v19, 0.0 }
 0x3c4   : > { %v692_v21 = vpop.xlane.xlu1 %691  ;;  %736 = vadd.xlane.f32.xlu1 %v735_v20 }
 0x3c5   : > { %v704_v22 = vsub.f32 %v672_v46, %v692_v21 }
 0x3c7   : > { %v717_v23 = vmul.f32 1.442695, %v704_v22 }
 0x3c9   : > { %1631 = vpow2.f32 %v717_v23 }
 0x3ca   : > { %v686_v24 = vpop.xlane.xlu2 %685 }
 0x3cb   : > { %v702_v25 = vsub.f32 %v670_v49, %v686_v24  ;;  %v1612_v49 = vpack.i.bf16 %v2144_v1, %v2125_v60 }
 0x3cc   : > { %1057 = vrot.lane.b32.xlu2 %v2149_v6, %s1910_s28 }
 0x3cd   : > { %v713_v26 = vmul.f32 1.442695, %v702_v25 }
 0x3cf   : > { %v2233_v28 = vpop.eup %1631  ;;  %1633 = vpow2.f32 %v713_v26 }
 0x3d0   : > { %v738_v29 = vsel %vm454_vm9, %v2233_v28, 0.0 }
 0x3d1   : > { %739 = vadd.xlane.f32.xlu1 %v738_v29 }
 0x3d5   : > { %v2237_v30 = vpop.eup %1633  ;;  %v698_v31 = vpop.xlane.xlu2 %697 }
 0x3d6   : > { %v706_v32 = vsub.f32 %v674_v52, %v698_v31  ;;  %v732_v33 = vsel %vm454_vm9, %v2237_v30, 0.0 }
 0x3d7   : > { %733 = vadd.xlane.f32.xlu0 %v732_v33  ;;  %v695_v34 = vpop.xlane.xlu0 %694 }
 0x3d8   : > { %v721_v35 = vmul.f32 1.442695, %v706_v32  ;;  %v705_v36 = vsub.f32 %v673_v55, %v695_v34 }
 0x3da   : > { %1635 = vpow2.f32 %v721_v35  ;;  %v719_v6 = vmul.f32 1.442695, %v705_v36 }
 0x3dc   : > { %1637 = vpow2.f32 %v719_v6 }
 0x3dd   : > { %v1604_v37 = vpop.permute.xlu2 %1603 }
 0x3de   : > { %v1606_v40 = vunpack.i.h.bf16 %v1604_v37  ;;  %v1605_v41 = vunpack.i.l.bf16 %v1604_v37 }
 0x3e0   : > { %v2241_v42 = vpop.eup %1635  ;;  %896 = vmatpush.msra.mxu3 %v1605_v41  ;;  %948 = vmatpush.msra.mxu1 %v1606_v40 }
 0x3e1   : > { %v744_v43 = vsel %vm454_vm9, %v2241_v42, 0.0 }
 0x3e2   : > { %v2245_v44 = vpop.eup %1637  ;;  %745 = vadd.xlane.f32.xlu0 %v744_v43 }
 0x3e3   : > { %v741_v45 = vsel %vm454_vm9, %v2245_v44, 0.0 }
 0x3e4   : > { %742 = vadd.xlane.f32.xlu1 %v741_v45 }
 0x3ea   : > { %v1609_v46 = vpop.permute.xlu0 %1608 }
 0x3eb   : > { %v1611_v47 = vunpack.i.h.bf16 %v1609_v46  ;;  %v1610_v48 = vunpack.i.l.bf16 %v1609_v46 }
 0x3ed   : > { %974 = vmatpush.msra.mxu2 %v1611_v47  ;;  %1000 = vmatpush.msrb.mxu3 %v1610_v48 }
 0x3f6   : > { %1005 = vrot.lane.b32.xlu0 %v2147_v3, %s1910_s28 }
 0x3fd   : > { %1613 = vrot.lane.b32.xlu1 %v1612_v49, %s1910_s28 }
 0x415   : > { %v725_v50 = vpop.xlane.xlu0 %724 }
 0x416   : > { %1639 = vrcp.f32 %v725_v50  ;;  %v758_v55 = vand.u32 2147483648, %v725_v50  ;;  %v756_v57 = vand.u32 2147483647, %v725_v50  ;;  %vm752_vm15 = vweird.f32 %v725_v50 }
 0x418   : > { %v759_v3 = vor.u32 1.1754944e-38, %v758_v55  ;;  %vm757_vm2 = vcmp.eq.f32.partialorder %v756_v57, 8.507059e+37 }
 0x41c   : > { %v1640_v51 = vpop.eup %1639 }
 0x41d   : > { %v748_v52 = vmul.f32 %v1640_v51, %v725_v50  ;;  %vm753_vm14 = vweird.f32 %v1640_v51 }
 0x41e   : > { %vm754_vm0 = vmor %vm752_vm15, %vm753_vm14 }
 0x41f   : > { %v749_v53 = vsub.f32 1.0, %v748_v52  ;;  %v2254_v54 = vpop.xlane.xlu2 %727 }
 0x421   : > { %v750_v56 = vmul.f32 %v1640_v51, %v749_v53 }
 0x423   : > { %v751_v59 = vadd.f32 %v1640_v51, %v750_v56 }
 0x425   : > { %v755_v61 = vsel %vm754_vm0, %v1640_v51, %v751_v59 }
 0x426   : > { %v760_v60 = vsel %vm757_vm2, %v759_v3, %v755_v61 }
 0x427   : > { %v731_v1 = vpop.xlane.xlu2 %730  ;;  %v761_v62 = vmul.f32 %v2215_v9, %v760_v60 }
 0x428   : > { %1641 = vrcp.f32 %v731_v1  ;;  %v788_v0 = vand.u32 2147483648, %v731_v1  ;;  %v786_v8 = vand.u32 2147483647, %v731_v1  ;;  %vm782_vm4 = vweird.f32 %v731_v1 }
 0x429   : > { %v867_v5 = vsel %vm2176_vm11, %v761_v62, 0.0 }
 0x42a   : > { %1483 = vmatmul.msk.f32.vlgmr.msra.gmra.mxu3 %vm454_vm9, %v867_v5  ;;  %v789_v16 = vor.u32 1.1754944e-38, %v788_v0  ;;  %vm787_vm6 = vcmp.eq.f32.partialorder %v786_v8, 8.507059e+37 }
 0x42e   : > { %v1642_v10 = vpop.eup %1641 }
 0x42f   : > { %v778_v11 = vmul.f32 %v1642_v10, %v731_v1  ;;  %v1058_v58 = vpop.permute.xlu2 %1057  ;;  %vm783_vm3 = vweird.f32 %v1642_v10 }
 0x430   : > { %1078 = vmatpush.msrb.mxu2 %v1058_v58  ;;  %vm784_vm5 = vmor %vm782_vm4, %vm783_vm3  ;;  %vm767_vm4 = vweird.f32 %v2254_v54 }
 0x431   : > { %v779_v63 = vsub.f32 1.0, %v778_v11 }
 0x433   : > { %v780_v13 = vmul.f32 %v1642_v10, %v779_v63 }
 0x435   : > { %v781_v15 = vadd.f32 %v1642_v10, %v780_v13  ;;  %v773_v13 = vand.u32 2147483648, %v2254_v54 }
 0x437   : > { %v737_v9 = vpop.xlane.xlu1 %736  ;;  %v785_v17 = vsel %vm784_vm5, %v1642_v10, %v781_v15 }
 0x438   : > { %1643 = vrcp.f32 %v737_v9  ;;  %v790_v18 = vsel %vm787_vm6, %v789_v16, %v785_v17  ;;  %v818_v25 = vand.u32 2147483648, %v737_v9  ;;  %v816_v29 = vand.u32 2147483647, %v737_v9 }
 0x439   : > { %v791_v20 = vmul.f32 %v2223_v14, %v790_v18  ;;  %vm812_vm8 = vweird.f32 %v737_v9 }
 0x43a   : > { %v819_v32 = vor.u32 1.1754944e-38, %v818_v25  ;;  %vm817_vm12 = vcmp.eq.f32.partialorder %v816_v29, 8.507059e+37 }
 0x43b   : > { %v869_v21 = vsel %vm2176_vm11, %v791_v20, 0.0 }
 0x43c   : > { %1485 = vmatmul.msk.f32.vlgmr.msra.gmra.mxu1 %vm454_vm9, %v869_v21 }
 0x43e   : > { %v1644_v22 = vpop.eup %1643 }
 0x43f   : > { %v808_v23 = vmul.f32 %v1644_v22, %v737_v9  ;;  %vm813_vm7 = vweird.f32 %v1644_v22 }
 0x440   : > { %vm814_vm10 = vmor %vm812_vm8, %vm813_vm7 }
 0x441   : > { %v809_v24 = vsub.f32 1.0, %v808_v23 }
 0x443   : > { %v810_v26 = vmul.f32 %v1644_v22, %v809_v24 }
 0x444   : > { %v2269_v6 = vpop.xlane.xlu1 %739 }
 0x445   : > { %v811_v31 = vadd.f32 %v1644_v22, %v810_v26 }
 0x447   : > { %v815_v33 = vsel %vm814_vm10, %v1644_v22, %v811_v31  ;;  %v771_v22 = vand.u32 2147483647, %v2254_v54 }
 0x448   : > { %v820_v34 = vsel %vm817_vm12, %v819_v32, %v815_v33  ;;  %v774_v32 = vor.u32 1.1754944e-38, %v773_v13 }
 0x449   : > { %v821_v14 = vmul.f32 %v2227_v19, %v820_v34 }
 0x44a   : > { %v734_v35 = vpop.xlane.xlu0 %733 }
 0x44b   : > { %1645 = vrcp.f32 %v734_v35  ;;  %v871_v36 = vsel %vm2176_vm11, %v821_v14, 0.0  ;;  %v803_v45 = vand.u32 2147483648, %v734_v35  ;;  %v801_v19 = vand.u32 2147483647, %v734_v35 }
 0x44c   : > { %1487 = vmatmul.msk.f32.vlgmr.msrb.gmra.mxu3 %vm454_vm9, %v871_v36  ;;  %1647 = vrcp.f32 %v2254_v54  ;;  %vm797_vm15 = vweird.f32 %v734_v35  ;;  %v831_v36 = vand.u32 2147483647, %v2269_v6 }
 0x44d   : > { %v804_v51 = vor.u32 1.1754944e-38, %v803_v45  ;;  %vm802_vm2 = vcmp.eq.f32.partialorder %v801_v19, 8.507059e+37 }
 0x451   : > { %v1646_v37 = vpop.eup %1645 }
 0x452   : > { %v793_v40 = vmul.f32 %v1646_v37, %v734_v35  ;;  %v2271_v43 = vpop.eup %1647  ;;  %vm798_vm14 = vweird.f32 %v1646_v37  ;;  %v833_v35 = vand.u32 2147483648, %v2269_v6 }
 0x453   : > { %v763_v49 = vmul.f32 %v2271_v43, %v2254_v54  ;;  %vm799_vm0 = vmor %vm797_vm15, %vm798_vm14  ;;  %vm768_vm5 = vweird.f32 %v2271_v43 }
 0x454   : > { %v794_v41 = vsub.f32 1.0, %v793_v40  ;;  %vm2291_vm12 = vmor %vm767_vm4, %vm768_vm5  ;;  %vm827_vm4 = vweird.f32 %v2269_v6 }
 0x455   : > { %v746_v46 = vpop.xlane.xlu0 %745  ;;  %v764_v56 = vsub.f32 1.0, %v763_v49 }
 0x456   : > { %v795_v47 = vmul.f32 %v1646_v37, %v794_v41  ;;  %1649 = vrcp.f32 %v746_v46  ;;  %v863_v11 = vand.u32 2147483648, %v746_v46  ;;  %vm857_vm6 = vweird.f32 %v746_v46 }
 0x457   : > { %1651 = vrcp.f32 %v2269_v6  ;;  %v743_v48 = vpop.xlane.xlu1 %742  ;;  %v765_v5 = vmul.f32 %v2271_v43, %v764_v56  ;;  %v1118_v56 = vld [vmem:[%s2076_s16 + $0x68] sm:$0xff] }
 0x458   : > { %v796_v50 = vadd.f32 %v1646_v37, %v795_v47  ;;  %1653 = vrcp.f32 %v743_v48  ;;  %v864_v9 = vor.u32 1.1754944e-38, %v863_v11  ;;  %v848_v18 = vand.u32 2147483648, %v743_v48  ;;  %1138 = vmatpush.msra.mxu3 %v1118_v56 }
 0x459   : > { %v766_v15 = vadd.f32 %v2271_v43, %v765_v5  ;;  %vm842_vm14 = vweird.f32 %v743_v48  ;;  %v846_v23 = vand.u32 2147483647, %v743_v48  ;;  %v834_v47 = vor.u32 1.1754944e-38, %v833_v35 }
 0x45a   : > { %v800_v52 = vsel %vm799_vm0, %v1646_v37, %v796_v50  ;;  %v849_v33 = vor.u32 1.1754944e-38, %v848_v18  ;;  %v1198_v56 = vperm.slane %v2115_v38, 3 }
 0x45b   : > { %v805_v53 = vsel %vm802_vm2, %v804_v51, %v800_v52  ;;  %v770_v29 = vsel %vm2291_vm12, %v2271_v43, %v766_v15  ;;  %vm847_vm0 = vcmp.eq.f32.partialorder %v846_v23, 8.507059e+37  ;;  %vm772_vm2 = vcmp.eq.f32.partialorder %v771_v22, 8.507059e+37 }
 0x45c   : > { %v1650_v55 = vpop.eup %1649  ;;  %v806_v57 = vmul.f32 %v2237_v30, %v805_v53  ;;  %v861_v30 = vand.u32 2147483647, %v746_v46  ;;  %v775_v54 = vsel %vm772_vm2, %v774_v32, %v770_v29 }
 0x45d   : > { %v2277_v59 = vpop.eup %1651  ;;  %v853_v3 = vmul.f32 %v1650_v55, %v746_v46  ;;  %vm858_vm3 = vweird.f32 %v1650_v55  ;;  %v776_v37 = vmul.f32 %v2219_v7, %v775_v54  ;;  %v1203_v54 = vld [vmem:[%s2076_s16 + $0x50] sm:$0xff] }
 0x45e   : > { %v1654_v61 = vpop.eup %1653  ;;  %v870_v60 = vsel %vm2186_vm13, %v806_v57, 0.0  ;;  %v823_v10 = vmul.f32 %v2277_v59, %v2269_v6  ;;  %vm859_vm7 = vmor %vm857_vm6, %vm858_vm3  ;;  %vm862_vm10 = vcmp.eq.f32.partialorder %v861_v30, 8.507059e+37  ;;  %vm828_vm3 = vweird.f32 %v2277_v59  ;;  %v1117_v57 = vld [vmem:[%s2076_s16 + $0x48] sm:$0xff] }
 0x45f   : > { %v854_v1 = vsub.f32 1.0, %v853_v3  ;;  %v838_v62 = vmul.f32 %v1654_v61, %v743_v48  ;;  %1486 = vmatmul.msk.f32.vlgmr.msra.gmra.mxu2 %vm454_vm9, %v870_v60  ;;  %vm843_vm8 = vweird.f32 %v1654_v61  ;;  %vm829_vm5 = vmor %vm827_vm4, %vm828_vm3  ;;  %vm832_vm6 = vcmp.eq.f32.partialorder %v831_v36, 8.507059e+37  ;;  %1139 = vmatpush.msra.mxu3 %v1117_v57  ;;  %v1115_v3 = vld [vmem:[%s2076_s16 + $0x8] sm:$0xff] }
 0x460   : > { %v824_v16 = vsub.f32 1.0, %v823_v10  ;;  %vm844_vm15 = vmor %vm842_vm14, %vm843_vm8  ;;  %v868_v19 = vsel %vm2186_vm13, %v776_v37, 0.0 }
 0x461   : > { %v855_v58 = vmul.f32 %v1650_v55, %v854_v1  ;;  %v839_v63 = vsub.f32 1.0, %v838_v62 }
 0x462   : > { %v825_v26 = vmul.f32 %v2277_v59, %v824_v16 }
 0x463   : > { %v856_v0 = vadd.f32 %v1650_v55, %v855_v58  ;;  %v840_v8 = vmul.f32 %v1654_v61, %v839_v63 }
 0x465   : > { %v841_v17 = vadd.f32 %v1654_v61, %v840_v8  ;;  %v860_v20 = vsel %vm859_vm7, %v1650_v55, %v856_v0  ;;  %v1119_v8 = vperm.slane %v2115_v38, 5 }
 0x466   : > { %v865_v24 = vsel %vm862_vm10, %v864_v9, %v860_v20 }
 0x467   : > { %v866_v25 = vmul.f32 %v2241_v42, %v865_v24  ;;  %v845_v31 = vsel %vm844_vm15, %v1654_v61, %v841_v17  ;;  %v826_v42 = vadd.f32 %v2277_v59, %v825_v26  ;;  %vm1246_vm15 = vcmask 523264  }
 0x468   : > { %v850_v14 = vsel %vm847_vm0, %v849_v33, %v845_v31  ;;  %v1006_v48 = vpop.permute.xlu0 %1005 }
 0x469   : > { %v874_v34 = vsel %vm2186_vm13, %v866_v25, 0.0  ;;  %v851_v40 = vmul.f32 %v2245_v44, %v850_v14  ;;  %v830_v46 = vsel %vm829_vm5, %v2277_v59, %v826_v42  ;;  %v1116_v59 = vld [vmem:[%s2076_s16 + $0x28] sm:$0xff]  ;;  %v1202_v14 = vld [vmem:[%s2076_s16 + $0x30] sm:$0xff] }
 0x46a   : > { %1490 = vmatmul.msk.f32.vlgmr.msrb.gmra.mxu2 %vm454_vm9, %v874_v34  ;;  %v835_v7 = vsel %vm832_vm6, %v834_v47, %v830_v46  ;;  %1140 = vmatpush.msra.mxu3 %v1116_v59  ;;  %v1204_v34 = vld [vmem:[%s2076_s16 + $0x70] sm:$0xff]  ;;  %v1241_v47 = vld [vmem:[%s2076_s16 + $0x98] sm:$0xff] }
 0x46b   : > { %v873_v6 = vsel %vm2176_vm11, %v851_v40, 0.0  ;;  %v836_v44 = vmul.f32 %v2233_v28, %v835_v7  ;;  %vm1109_vm11 = vcmask 130048   ;;  %v1201_v42 = vld [vmem:[%s2076_s16 + $0x10] sm:$0xff]  ;;  %v1244_v40 = vld [vmem:[%s2076_s16 + $0xf8] sm:$0xff] }
 0x46c   : > { %1141 = vmatpush.msra.mxu3 %v1115_v3  ;;  %v1240_v7 = vld [vmem:[%s2076_s16 + $0x78] sm:$0xff] }
 0x46d   : > { %v872_v49 = vsel %vm2186_vm13, %v836_v44, 0.0  ;;  %vm1112_vm13 = vcmask 195584  }
 0x46f   : > { %v1614_v41 = vpop.permute.xlu1 %1613 }
 0x470   : > { %v1616_v43 = vunpack.i.h.bf16 %v1614_v41  ;;  %v1615_v45 = vunpack.i.l.bf16 %v1614_v41  ;;  %v1243_v41 = vld [vmem:[%s2076_s16 + $0xd8] sm:$0xff] }
 0x472   : > { %922 = vmatpush.msrb.mxu0 %v1615_v45  ;;  %1052 = vmatpush.msrb.mxu1 %v1616_v43  ;;  %v1242_v43 = vld [vmem:[%s2076_s16 + $0xb8] sm:$0xff] }
 0x473   : > { %1484 = vmatmul.msk.f32.vlgmr.msrb.gmra.mxu0 %vm454_vm9, %v868_v19  ;;  %1489 = vmatmul.msk.f32.vlgmr.msrb.gmra.mxu1 %vm454_vm9, %v873_v6 }
 0x474   : > { %1026 = vmatpush.msra.mxu0 %v1006_v48  ;;  %1261 = vmatpush.msra.mxu1 %v1244_v40 }
 0x476   : > { %1224 = vmatpush.msrb.mxu0 %v1204_v34  ;;  %1262 = vmatpush.msra.mxu1 %v1243_v41 }
 0x478   : > { %1225 = vmatpush.msrb.mxu0 %v1203_v54  ;;  %1263 = vmatpush.msra.mxu1 %v1242_v43 }
 0x47a   : > { %1226 = vmatpush.msrb.mxu0 %v1202_v14  ;;  %1264 = vmatpush.msra.mxu1 %v1241_v47 }
 0x47b   : > { %1488 = vmatmul.msk.f32.vlgmr.msra.gmra.mxu0 %vm454_vm9, %v872_v49 }
 0x47c   : > { %1227 = vmatpush.msrb.mxu0 %v1201_v42  ;;  %1265 = vmatpush.msra.mxu1 %v1240_v7 }
 0x4ad   : > { %v898_v27 = vpop.f32.mrf.mxu3 }
 0x4b9   : > { %v950_v50 = vpop.f32.mrf.mxu1 }
 0x4ba   : > { %1085 = vrot.lane.b32.xlu2 %v950_v50, %s1911_s6 }
 0x4cf   : > { %v1002_v51 = vpop.f32.mrf.mxu3 }
 0x4d0   : > { %1093 = vrot.lane.b32.xlu0 %v1002_v51, %s1912_s7 }
 0x4e2   : > { %v976_v52 = vpop.f32.mrf.mxu2 }
 0x4e3   : > { %1087 = vrot.lane.b32.xlu2 %v976_v52, %s1911_s6  ;;  %v1195_v52 = vperm.slane %v2115_v38, 2 }
 0x4ed   : > { %v1080_v53 = vpop.f32.mrf.mxu2 }
 0x4f0   : > { %v924_v28 = vpop.f32.mrf.mxu0  ;;  %v1054_v39 = vpop.f32.mrf.mxu1 }
 0x4f1   : > { %1101 = vrot.lane.b32.xlu1 %v1054_v39, %s1913_s8 }
 0x4f8   : > { %v1028_v55 = vpop.f32.mrf.mxu0 }
 0x4f9   : > { %1103 = vrot.lane.b32.xlu1 %v1080_v53, %s1913_s8  ;;  %1095 = vrot.lane.b32.xlu0 %v1028_v55, %s1912_s7 }
 0x514   : > { %v1086_v61 = vpop.permute.xlu2 %1085 }
 0x515   : > { %v1107_v1 = vsel %vm454_vm9, %v898_v27, %v1086_v61 }
 0x53d   : > { %v1088_v11 = vpop.permute.xlu2 %1087 }
 0x53e   : > { %v1108_v58 = vsel %vm454_vm9, %v924_v28, %v1088_v11  ;;  %v1239_v11 = vld [vmem:[%s2076_s16 + $0x58] sm:$0xff] }
 0x53f   : > { %1266 = vmatpush.msra.mxu1 %v1239_v11 }
 0x542   : > { %v1094_v60 = vpop.permute.xlu0 %1093 }
 0x543   : > { %v1110_v62 = vsel %vm1109_vm11, %v1107_v1, %v1094_v60 }
 0x563   : > { %v1102_v5 = vpop.permute.xlu1 %1101 }
 0x564   : > { %v1113_v10 = vsel %vm1112_vm13, %v1110_v62, %v1102_v5 }
 0x565   : > { %1491 = vmatmul.msk.f32.vlgmr.msra.gmra.mxu3 %vm330_vm1, %v1113_v10 }
 0x56b   : > { %v1104_v30 = vpop.permute.xlu1 %1103  ;;  %v1096_v63 = vpop.permute.xlu0 %1095 }
 0x56c   : > { %v1111_v13 = vsel %vm1109_vm11, %v1108_v58, %v1096_v63  ;;  %v1238_v58 = vld [vmem:[%s2076_s16 + $0x38] sm:$0xff]  ;;  %v1205_v63 = vperm.slane %v2115_v38, 6 }
 0x56d   : > { %v1114_v0 = vsel %vm1112_vm13, %v1111_v13, %v1104_v30  ;;  %1267 = vmatpush.msra.mxu1 %v1238_v58  ;;  %v1237_v30 = vld [vmem:[%s2076_s16 + $0x18] sm:$0xff] }
 0x56e   : > { %1492 = vmatmul.msk.f32.gmra.mxu3 %vm330_vm1, %v1114_v0 }
 0x56f   : > { %1268 = vmatpush.msra.mxu1 %v1237_v30 }
 0x5e8   : > { %v1143_v15 = vpop.f32.mrf.mxu3 }
 0x5e9   : > { %v1144_v16 = vadd.f32 %v1143_v15, %v1119_v8 }
 0x5eb   : > { %v2334_v9 = vadd.f32 %v1144_v16, %v2091_v2 }
 0x5ed   : > { %v1151_v17 = vsel %vm330_vm1, %v2334_v9, 0.0 }
 0x5ee   : > { %1152 = vadd.xlane.f32.xlu2 %v1151_v17 }
 0x5f1   : > { %v1146_v18 = vpop.f32.mrf.mxu3 }
 0x5f2   : > { %v1147_v20 = vadd.f32 %v1146_v18, %v1119_v8  ;;  %v1245_v18 = vperm.slane %v2115_v38, 7 }
 0x5f4   : > { %v2339_v21 = vadd.f32 %v1147_v20, %v2095_v4 }
 0x5f6   : > { %v1154_v22 = vsel %vm330_vm1, %v2339_v21, 0.0 }
 0x5f7   : > { %1155 = vadd.xlane.f32.xlu0 %v1154_v22 }
 0x661   : > { %v1153_v23 = vpop.xlane.xlu2 %1152 }
 0x662   : > { %v1157_v2 = vmul.f32 %v1153_v23, %v2099_v12 }
 0x664   : > { %v1159_v24 = vsub.f32 %v2334_v9, %v1157_v2 }
 0x666   : > { %v1161_v25 = vmul.f32 %v1159_v24, %v1159_v24 }
 0x668   : > { %v1163_v26 = vsel %vm330_vm1, %v1161_v25, 0.0 }
 0x669   : > { %1164 = vadd.xlane.f32.xlu1 %v1163_v26 }
 0x66a   : > { %v1156_v29 = vpop.xlane.xlu0 %1155 }
 0x66b   : > { %v1158_v4 = vmul.f32 %v1156_v29, %v2099_v12 }
 0x66d   : > { %v1160_v31 = vsub.f32 %v2339_v21, %v1158_v4 }
 0x66f   : > { %v1162_v32 = vmul.f32 %v1160_v31, %v1160_v31 }
 0x671   : > { %v1166_v33 = vsel %vm330_vm1, %v1162_v32, 0.0 }
 0x672   : > { %1167 = vadd.xlane.f32.xlu2 %v1166_v33 }
 0x6dc   : > { %v1165_v35 = vpop.xlane.xlu1 %1164 }
 0x6dd   : > { %v1169_v36 = vmul.f32 %v1165_v35, %v2099_v12 }
 0x6df   : > { %v1171_v37 = vadd.f32 1e-12, %v1169_v36 }
 0x6e1   : > { %1655 = vrsqrt.f32 %v1171_v37  ;;  %vm1179_vm7 = vweird.f32 %v1171_v37 }
 0x6e5   : > { %v1168_v45 = vpop.xlane.xlu2 %1167 }
 0x6e6   : > { %v1170_v46 = vmul.f32 %v1168_v45, %v2099_v12 }
 0x6e7   : > { %v1656_v19 = vpop.eup %1655 }
 0x6e8   : > { %v1174_v6 = vmul.f32 %v1656_v19, %v1171_v37  ;;  %v1172_v48 = vadd.f32 1e-12, %v1170_v46  ;;  %vm1180_vm9 = vweird.f32 %v1656_v19 }
 0x6e9   : > { %vm1181_vm8 = vmor %vm1179_vm7, %vm1180_vm9 }
 0x6ea   : > { %v1175_v44 = vmul.f32 %v1656_v19, %v1174_v6  ;;  %1657 = vrsqrt.f32 %v1172_v48  ;;  %vm1189_vm12 = vweird.f32 %v1172_v48 }
 0x6ec   : > { %v1176_v49 = vmul.f32 0.5, %v1175_v44 }
 0x6ee   : > { %v1177_v50 = vsub.f32 1.5, %v1176_v49 }
 0x6f0   : > { %v1658_v27 = vpop.eup %1657  ;;  %v1178_v51 = vmul.f32 %v1656_v19, %v1177_v50 }
 0x6f1   : > { %v1184_v28 = vmul.f32 %v1658_v27, %v1172_v48  ;;  %vm1190_vm10 = vweird.f32 %v1658_v27 }
 0x6f2   : > { %v1182_v39 = vsel %vm1181_vm8, %v1656_v19, %v1178_v51  ;;  %vm1191_vm14 = vmor %vm1189_vm12, %vm1190_vm10 }
 0x6f3   : > { %v1193_v53 = vmul.f32 %v1182_v39, %v1159_v24  ;;  %v1185_v55 = vmul.f32 %v1658_v27, %v1184_v28 }
 0x6f5   : > { %v1196_v57 = vmul.f32 %v1195_v52, %v1193_v53  ;;  %v1186_v59 = vmul.f32 0.5, %v1185_v55 }
 0x6f7   : > { %v1187_v3 = vsub.f32 1.5, %v1186_v59  ;;  %v1199_v61 = vadd.f32 %v1198_v56, %v1196_v57 }
 0x6f9   : > { %v1188_v60 = vmul.f32 %v1658_v27, %v1187_v3  ;;  %1493 = vmatmul.msk.f32.vlgmr.msrb.gmra.mxu0 %vm330_vm1, %v1199_v61 }
 0x6fb   : > { %v1192_v1 = vsel %vm1191_vm14, %v1658_v27, %v1188_v60 }
 0x6fc   : > { %v1194_v62 = vmul.f32 %v1192_v1, %v1160_v31 }
 0x6fe   : > { %v1197_v5 = vmul.f32 %v1195_v52, %v1194_v62 }
 0x700   : > { %v1200_v10 = vadd.f32 %v1198_v56, %v1197_v5 }
 0x702   : > { %1494 = vmatmul.msk.f32.gmra.mxu0 %vm330_vm1, %v1200_v10 }
 0x776   : > { %v1229_v13 = vpop.f32.mrf.mxu0 }
 0x777   : > { %v1230_v0 = vadd.f32 %v1229_v13, %v1205_v63 }
 0x779   : > { %v1235_v8 = vmax.f32 %v1230_v0, 0.0 }
 0x77b   : > { %1495 = vmatmul.msk.f32.vlgmr.msra.gmra.mxu1 %vm1246_vm15, %v1235_v8 }
 0x77f   : > { %v1232_v15 = vpop.f32.mrf.mxu0 }
 0x780   : > { %v1233_v16 = vadd.f32 %v1232_v15, %v1205_v63 }
 0x782   : > { %v1236_v17 = vmax.f32 %v1233_v16, 0.0 }
 0x784   : > { %1496 = vmatmul.msk.f32.gmra.mxu1 %vm1246_vm15, %v1236_v17 }
 0x7f8   : > { %v1270_v20 = vpop.f32.mrf.mxu1 }
 0x7f9   : > { %v1271_v22 = vadd.f32 %v1270_v20, %v1245_v18 }
 0x7fb   : > { %v1276_v23 = vadd.f32 %v1271_v22, %v2334_v9 }
 0x7fd   : > { %1278 = vst.msk [vmem:[#allocation10] sm:$0xff] %vm330_vm1, %v1276_v23 }
 0x801   : > { %v1273_v2 = vpop.f32.mrf.mxu1 }
 0x802   : > { %v1274_v24 = vadd.f32 %v1273_v2, %v1245_v18  ;;  %1283 = sbr.rel (%p1497_p1) target bundleno = 2332 (0x91c), region = 68 }
 0x804   : > { %v1277_v25 = vadd.f32 %v1274_v24, %v2339_v21 }
 0x806   : > { %1279 = vst.msk [vmem:[#allocation10 + $0x8] sm:$0xff] %vm330_vm1, %v1277_v25 }
 0x807   : > { %v1286_v26 = vsel %vm330_vm1, %v1276_v23, 0.0  ;;  %v1289_v38 = vsel %vm330_vm1, %v1277_v25, 0.0  ;;  %v1659_v44 = vld [vmem:[#allocation9] ss:$0 sm:$0xff]  ;;  %v1660_v51 = vld [vmem:[#allocation9 + $0x1] ss:$0 sm:$0xff] }
 0x808   : > { %1287 = vadd.xlane.f32.xlu0 %v1286_v26 }
 0x810   : > { %1290 = vadd.xlane.f32.xlu0 %v1289_v38 }
 0x87b   : > { %v1288_v29 = vpop.xlane.xlu0 %1287 }
 0x87c   : > { %v1292_v9 = vmul.f32 %v1288_v29, %v2099_v12 }
 0x87e   : > { %v1294_v4 = vsub.f32 %v1276_v23, %v1292_v9 }
 0x880   : > { %v1296_v31 = vmul.f32 %v1294_v4, %v1294_v4 }
 0x882   : > { %v1298_v32 = vsel %vm330_vm1, %v1296_v31, 0.0 }
 0x883   : > { %1299 = vadd.xlane.f32.xlu1 %v1298_v32  ;;  %v1291_v21 = vpop.xlane.xlu0 %1290 }
 0x884   : > { %v1293_v33 = vmul.f32 %v1291_v21, %v2099_v12 }
 0x886   : > { %v1295_v34 = vsub.f32 %v1277_v25, %v1293_v33 }
 0x888   : > { %v1297_v54 = vmul.f32 %v1295_v34, %v1295_v34 }
 0x88a   : > { %v1301_v14 = vsel %vm330_vm1, %v1297_v54, 0.0 }
 0x88b   : > { %1302 = vadd.xlane.f32.xlu1 %v1301_v14 }
 0x8f6   : > { %v1300_v42 = vpop.xlane.xlu1 %1299 }
 0x8f7   : > { %v1304_v35 = vmul.f32 %v1300_v42, %v2099_v12 }
 0x8f9   : > { %v1306_v36 = vadd.f32 1e-12, %v1304_v35 }
 0x8fb   : > { %1661 = vrsqrt.f32 %v1306_v36  ;;  %vm1314_vm2 = vweird.f32 %v1306_v36 }
 0x8fe   : > { %v1303_v37 = vpop.xlane.xlu1 %1302 }
 0x8ff   : > { %v1305_v40 = vmul.f32 %v1303_v37, %v2099_v12 }
 0x901   : > { %v1662_v41 = vpop.eup %1661  ;;  %v1307_v43 = vadd.f32 1e-12, %v1305_v40 }
 0x902   : > { %v1309_v45 = vmul.f32 %v1662_v41, %v1306_v36  ;;  %vm1315_vm0 = vweird.f32 %v1662_v41 }
 0x903   : > { %1663 = vrsqrt.f32 %v1307_v43  ;;  %vm1316_vm3 = vmor %vm1314_vm2, %vm1315_vm0  ;;  %vm1324_vm5 = vweird.f32 %v1307_v43 }
 0x904   : > { %v1310_v46 = vmul.f32 %v1662_v41, %v1309_v45 }
 0x906   : > { %v1311_v47 = vmul.f32 0.5, %v1310_v46 }
 0x908   : > { %v1312_v19 = vsub.f32 1.5, %v1311_v47 }
 0x909   : > { %v1664_v6 = vpop.eup %1663 }
 0x90a   : > { %v1313_v48 = vmul.f32 %v1662_v41, %v1312_v19  ;;  %v1319_v7 = vmul.f32 %v1664_v6, %v1307_v43  ;;  %vm1325_vm4 = vweird.f32 %v1664_v6 }
 0x90b   : > { %vm1326_vm6 = vmor %vm1324_vm5, %vm1325_vm4 }
 0x90c   : > { %v1317_v49 = vsel %vm1316_vm3, %v1662_v41, %v1313_v48  ;;  %v1320_v50 = vmul.f32 %v1664_v6, %v1319_v7 }
 0x90d   : > { %v1328_v27 = vmul.f32 %v1317_v49, %v1294_v4 }
 0x90e   : > { %v1321_v52 = vmul.f32 0.5, %v1320_v50 }
 0x90f   : > { %v1331_v12 = vmul.f32 %v1659_v44, %v1328_v27 }
 0x910   : > { %v1322_v28 = vsub.f32 1.5, %v1321_v52 }
 0x911   : > { %v1334_v39 = vadd.f32 %v1660_v51, %v1331_v12 }
 0x912   : > { %v1323_v53 = vmul.f32 %v1664_v6, %v1322_v28 }
 0x913   : > { %1336 = vst.msk [vmem:[#allocation10] sm:$0xff] %vm330_vm1, %v1334_v39 }
 0x914   : > { %v1327_v55 = vsel %vm1326_vm6, %v1664_v6, %v1323_v53 }
 0x915   : > { %v1329_v56 = vmul.f32 %v1327_v55, %v1295_v34 }
 0x917   : > { %v1332_v57 = vmul.f32 %v1659_v44, %v1329_v56 }
 0x919   : > { %v1335_v59 = vadd.f32 %v1660_v51, %v1332_v57 }
 0x91b   : > { %1337 = vst.msk [vmem:[#allocation10 + $0x8] sm:$0xff] %vm330_vm1, %v1335_v59 }
 0x91c PF: > { %p1547_p4 = scmp.eq.s32.totalorder %s1965_s22, 5  ;;  %s1914_s9 = smov [#allocation10]  }
 0x91d   : > { %s1343_s10 = sshll.u32 %s1914_s9, 4  ;;  %s1345_s21 = sshll.u32 %s2407_s5, 4  ;;  %s1344_s10 = int_to_ptr.vmem [resolvable:$true] %s1343_s10  ;;  %s1346_s21 = int_to_ptr.hbm [resolvable:$true] %s1345_s21 }
 0x91e   : > { %s1915_s14 = smov 128  }
 0x91f   : > { %1520 = dma.vmem_to_hbm [thread:$0]  (%p1547_p4), %s1344_s10, 256, %s1346_s21, [#allocation4], %s1915_s14, %s1915_s14, %s1911_s6  }
 0x920   : > { %1876 = dma.done.wait (%p1547_p4), [#allocation4], 256  }
 0x921   : > { %1878 = vsyncadd (%p1547_p4), [#allocation4], 4294967040 }
 0x922 PF: > { %s2422_s24 = smov %s2010_s18  ;;  %p15_p5 = scmp.ge.s32.totalorder %s2001_s15, 8  }
 0x923   : > { %s2423_s18 = smov %s1885_s19  ;;  %s2424_s19 = smov %s1889_s20 }
 0x924   : > { %s2425_s20 = smov %s2422_s24  ;;  %s2426_s21 = smov %s2001_s15 }
 0x925   :  { %17 = sbr.rel (!%p15_p5) target bundleno = 7 (0x7), region = 107 }
 0x92a   :  { %1362 = vsyncpa [#allocation3], 1 }
 0x92b   :  { %1364 = vsyncpa [#allocation3 + $0x1], 1 }
 0x92c   :  { %1365 = vsyncpa [#allocation6], 1 }
 0x92d   :  { %1366 = vsyncpa [#allocation4], 1 }
 0x92e   :  { %1368 = vsyncpa [#allocation4 + $0x1], 1 }

</bundles_post_ra>
